<compile_context>
chip_gen: v5e
topology: v5e:2x2
jax: 0.10.0
libtpu: 0.0.40
codegen_flags: <defaults>
</compile_context>

<pallas_src>
import jax
import jax.numpy as jnp
from jax import lax
from jax.experimental import pallas as pl
from jax.experimental.pallas import tpu as pltpu

LANE = 128
SUB = 8


def _round_up(x, m):
    return (x + m - 1) // m * m


def _make_bottleneck_kernel(W, TH, WS, Cp, Pp, RT):
    """Kernel for one (image, row-tile) grid step.

    Ref shapes:
      x_hbm  : (N, H, W, Cp)     bf16  unpadded activation, HBM (manual DMA)
      w1_ref : (Cp, Pp)          bf16  (bn1 scale folded in)
      b1_ref : (1, Pp)           f32
      w2_ref : (3*Pp, 3*Pp)      bf16  rows = (dx, in-ch), cols = (dy, out-ch)
      b2_ref : (1, Pp)           f32
      w3_ref : (Pp, Cp)          bf16  (bn3 scale folded in)
      b3_ref : (1, Cp)           f32
      o_ref  : (1, TH, W, Cp)    f32   lane-dense, halo-free output block
      xbuf   : (TH+2, WS, Cp)    bf16  VMEM halo slab
      sem    : DMA semaphores (3,)
    """
    bf16 = jnp.bfloat16
    f32 = jnp.float32

    def kernel(x_hbm, w1_ref, b1_ref, w2_ref, b2_ref, w3_ref, b3_ref,
               o_ref, xbuf, sem):
        n = pl.program_id(0)
        r = pl.program_id(1)
        row0 = r * TH

        # ---- manual DMA of the (TH+2)-row halo slab (bf16) -------------------
        main_cp = pltpu.make_async_copy(
            x_hbm.at[n, pl.ds(row0, TH)],
            xbuf.at[pl.ds(1, TH), pl.ds(0, W)],
            sem.at[0])
        main_cp.start()

        @pl.when(r > 0)
        def _():
            pltpu.make_async_copy(x_hbm.at[n, pl.ds(row0 - 1, 1)],
                                  xbuf.at[pl.ds(0, 1), pl.ds(0, W)],
                                  sem.at[1]).start()

        @pl.when(r == 0)                       # top of image: zero halo row
        def _():
            xbuf[0] = jnp.zeros((WS, Cp), bf16)

        @pl.when(r < RT - 1)
        def _():
            pltpu.make_async_copy(x_hbm.at[n, pl.ds(row0 + TH, 1)],
                                  xbuf.at[pl.ds(TH + 1, 1), pl.ds(0, W)],
                                  sem.at[2]).start()

        @pl.when(r == RT - 1)                  # bottom of image: zero halo row
        def _():
            xbuf[TH + 1] = jnp.zeros((WS, Cp), bf16)

        main_cp.wait()

        @pl.when(r > 0)
        def _():
            pltpu.make_async_copy(x_hbm.at[n, pl.ds(row0 - 1, 1)],
                                  xbuf.at[pl.ds(0, 1), pl.ds(0, W)],
                                  sem.at[1]).wait()

        @pl.when(r < RT - 1)
        def _():
            pltpu.make_async_copy(x_hbm.at[n, pl.ds(row0 + TH, 1)],
                                  xbuf.at[pl.ds(TH + 1, 1), pl.ds(0, W)],
                                  sem.at[2]).wait()

        # ---- x = relu(x); residual source (bf16, upcast only for the add) ----
        xr = jnp.maximum(xbuf[...], 0.0)                 # (TH+2, WS, Cp) bf16
        if WS > W:                                       # zero stale pad columns
            colx = lax.broadcasted_iota(jnp.int32, (1, WS, 1), 1)
            xr = jnp.where(colx < W, xr, jnp.zeros_like(xr))

        m1 = (TH + 2) * WS

        # ---- conv1 (1x1) + bn1 + relu : single bf16 MXU matmul ---------------
        t = jnp.dot(xr.reshape(m1, Cp), w1_ref[...],
                    preferred_element_type=f32)
        t = jnp.maximum(t.reshape(TH + 2, WS, Pp) + b1_ref[...], 0.0)

        # Zero the single out-of-image halo row (first / last row tiles only)
        # so conv2 sees true zero padding (the bn1 bias would otherwise leak).
        ridx = lax.broadcasted_iota(jnp.int32, (TH + 2, 1, 1), 0)
        halo_bad = ((ridx == 0) & (r == 0)) | ((ridx == TH + 1) & (r == RT - 1))
        t = jnp.where(halo_bad, 0.0, t)

        # ---- conv2 (3x3) as im2col over dx ------------------------------------
        # u[., x, dx*Pp:(dx+1)*Pp] = t[., x+dx-1, :], zero at the W boundary.
        col = lax.broadcasted_iota(jnp.int32, (1, WS, 1), 1)
        t_l = jnp.where(col >= 1, pltpu.roll(t, 1, 1), 0.0)         # dx = 0
        t_r = jnp.where(col < W - 1, pltpu.roll(t, WS - 1, 1), 0.0)  # dx = 2
        u = jnp.concatenate([t_l, t, t_r], axis=-1).astype(bf16)    # (TH+2,WS,3Pp)

        # z[., ., dy*Pp:(dy+1)*Pp] = sum_dx u_dx @ w2[dy, dx]   (K = 3*Pp)
        z = jnp.dot(u.reshape(m1, 3 * Pp), w2_ref[...],
                    preferred_element_type=f32).reshape(TH + 2, WS, 3 * Pp)

        # dy reduction = 3 row-offset adds (outer-dim offsets, 128-aligned lane
        # slices), accumulated functionally and written exactly once.
        out2 = (z[0:TH, :, 0:Pp]
                + z[1:TH + 1, :, Pp:2 * Pp]
                + z[2:TH + 2, :, 2 * Pp:3 * Pp])

        # ---- bn2 + relu -------------------------------------------------------
        t2 = jnp.maximum(out2 + b2_ref[...], 0.0)        # (TH, WS, Pp) f32

        # ---- conv3 (1x1) + bn3 + residual (module has no trailing relu) -------
        m3 = TH * WS
        t3 = jnp.dot(t2.reshape(m3, Pp).astype(bf16), w3_ref[...],
                     preferred_element_type=f32)
        t3 = t3.reshape(TH, WS, Cp) + b3_ref[...]
        res = t3 + xr[1:TH + 1].astype(f32)

        o_ref[0] = res if WS == W else res[:, :W, :]

    return kernel


def bottleneck_forward(x_nhwc, params, *, tile_h=None):
    """Bottleneck forward (stride=1, dilation=1, downsample=None), NHWC f32 in/out."""
    N, H, W, Cin = x_nhwc.shape
    P = params["w1"].shape[1]
    Cout = params["w3"].shape[1]
    assert Cout == Cin, "downsample is None => inplanes must equal planes*4"

    f32, bf16 = jnp.float32, jnp.bfloat16
    Cp = _round_up(Cin, LANE)              # lane-dense channels
    Pp = _round_up(P, LANE)
    WS = _round_up(W, SUB)                 # sublane-aligned working width

    if tile_h is None:
        tile_h = 8 if (H % 8 == 0 and H > 8) else H
    TH = tile_h
    assert H % TH == 0
    RT = H // TH

    # Fold BN scales into the conv weights, pad channels to 128 lanes, cast bf16.
    w1 = params["w1"] * params["s1"][None, :]
    w2 = params["w2"] * params["s2"][None, None, None, :]
    w3 = params["w3"] * params["s3"][None, :]
    w1p = jnp.zeros((Cp, Pp), f32).at[:Cin, :P].set(w1).astype(bf16)
    w2p = jnp.zeros((3, 3, Pp, Pp), f32).at[:, :, :P, :P].set(w2)   # (dy,dx,in,out)
    # conv2 weight: rows = (dx, in-ch), cols = (dy, out-ch).
    w2cat = jnp.transpose(w2p, (1, 2, 0, 3)).reshape(3 * Pp, 3 * Pp).astype(bf16)
    w3p = jnp.zeros((Pp, Cp), f32).at[:P, :Cout].set(w3).astype(bf16)
    b1p = jnp.zeros((1, Pp), f32).at[0, :P].set(params["b1"])
    b2p = jnp.zeros((1, Pp), f32).at[0, :P].set(params["b2"])
    b3p = jnp.zeros((1, Cp), f32).at[0, :Cout].set(params["b3"])

    # Activation: bf16, channel-padded only. No spatial pre-pad in HBM; the
    # 1-row / 1-col zero halo is synthesized inside the kernel.
    x16 = x_nhwc.astype(bf16)
    if Cp != Cin:
        x16 = jnp.pad(x16, ((0, 0), (0, 0), (0, 0), (0, Cp - Cin)))

    kernel = _make_bottleneck_kernel(W, TH, WS, Cp, Pp, RT)
    wmap = lambda n, r: (0, 0)

    out_full = pl.pallas_call(
        kernel,
        out_shape=jax.ShapeDtypeStruct((N, H, W, Cp), f32),
        grid=(N, RT),
        in_specs=[
            pl.BlockSpec(memory_space=pl.ANY),          # x: HBM, manual halo DMA
            pl.BlockSpec((Cp, Pp), wmap),               # w1 (bn1 scale folded)
            pl.BlockSpec((1, Pp), wmap),                # b1
            pl.BlockSpec((3 * Pp, 3 * Pp), wmap),       # w2 (dx rows, dy cols)
            pl.BlockSpec((1, Pp), wmap),                # b2
            pl.BlockSpec((Pp, Cp), wmap),               # w3 (bn3 scale folded)
            pl.BlockSpec((1, Cp), wmap),                # b3
        ],
        out_specs=pl.BlockSpec((1, TH, W, Cp), lambda n, r: (n, r, 0, 0)),
        scratch_shapes=[
            pltpu.VMEM((TH + 2, WS, Cp), bf16),         # halo slab buffer
            pltpu.SemaphoreType.DMA((3,)),
        ],
        compiler_params=pltpu.CompilerParams(
            dimension_semantics=("parallel", "parallel"),
            vmem_limit_bytes=32 * 1024 * 1024),
    )(x16, w1p, b1p, w2cat, b2p, w3p, b3p)

    # Channel-only crop (no-op for real ResNet widths where Cout % 128 == 0).
    return out_full if Cout == Cp else out_full[..., :Cout]


# ---------------------------------------------------------------------------
# References
# ---------------------------------------------------------------------------
def bottleneck_reference_f32(x_nhwc, params):
    """Exact f32 math of the PyTorch module (inference-mode BN)."""
    dn = ("NHWC", "HWIO", "NHWC")
    Cin = x_nhwc.shape[-1]
    P = params["w1"].shape[1]
    Cout = params["w3"].shape[1]
    xr = jnp.maximum(x_nhwc, 0.0)
    t = lax.conv_general_dilated(xr, params["w1"].reshape(1, 1, Cin, P),
                                 (1, 1), "VALID", dimension_numbers=dn)
    t = jnp.maximum(t * params["s1"] + params["b1"], 0.0)
    t = lax.conv_general_dilated(t, params["w2"], (1, 1), [(1, 1), (1, 1)],
                                 dimension_numbers=dn)
    t = jnp.maximum(t * params["s2"] + params["b2"], 0.0)
    t = lax.conv_general_dilated(t, params["w3"].reshape(1, 1, P, Cout),
                                 (1, 1), "VALID", dimension_numbers=dn)
    t = t * params["s3"] + params["b3"]
    return t + xr


def bottleneck_reference_bf16(x_nhwc, params):
    """Mirrors the kernel numerics: bf16 activations/weights (BN scales folded),
    f32 accumulation, f32 bias / relu / residual."""
    dn = ("NHWC", "HWIO", "NHWC")
    bf16, f32 = jnp.bfloat16, jnp.float32
    Cin = x_nhwc.shape[-1]
    P = params["w1"].shape[1]
    Cout = params["w3"].shape[1]
    w1 = (params["w1"] * params["s1"][None, :]).astype(bf16)
    w2 = (params["w2"] * params["s2"][None, None, None, :]).astype(bf16)
    w3 = (params["w3"] * params["s3"][None, :]).astype(bf16)
    xr = jnp.maximum(x_nhwc.astype(bf16), 0.0)
    t = lax.conv_general_dilated(xr, w1.reshape(1, 1, Cin, P), (1, 1), "VALID",
                                 dimension_numbers=dn,
                                 preferred_element_type=f32)
    t = jnp.maximum(t + params["b1"], 0.0)
    t = lax.conv_general_dilated(t.astype(bf16), w2, (1, 1), [(1, 1), (1, 1)],
                                 dimension_numbers=dn,
                                 preferred_element_type=f32)
    t = jnp.maximum(t + params["b2"], 0.0)
    t = lax.conv_general_dilated(t.astype(bf16), w3.reshape(1, 1, P, Cout),
                                 (1, 1), "VALID", dimension_numbers=dn,
                                 preferred_element_type=f32)
    t = t + params["b3"]
    return t + xr.astype(f32)


# ---------------------------------------------------------------------------
# Parameter construction (BatchNorm folded to scale/bias, inference mode)
# ---------------------------------------------------------------------------
def _folded_bn(key, c, eps=1e-5):
    k1, k2, k3, k4 = jax.random.split(key, 4)
    gamma = 1.0 + 0.1 * jax.random.normal(k1, (c,), jnp.float32)
    beta = 0.1 * jax.random.normal(k2, (c,), jnp.float32)
    mean = 0.1 * jax.random.normal(k3, (c,), jnp.float32)
    var = jnp.abs(jax.random.normal(k4, (c,), jnp.float32)) + 0.5
    scale = gamma / jnp.sqrt(var + eps)
    bias = beta - mean * scale
    return scale, bias


def make_params(key, inplanes, planes):
    cout = planes * 4
    assert cout == inplanes, "downsample is None => inplanes must equal planes*4"
    keys = jax.random.split(key, 6)
    w1 = 0.1 * jax.random.normal(keys[0], (inplanes, planes), jnp.float32)
    w2 = 0.1 * jax.random.normal(keys[1], (3, 3, planes, planes), jnp.float32)
    w3 = 0.1 * jax.random.normal(keys[2], (planes, cout), jnp.float32)
    s1, b1 = _folded_bn(keys[3], planes)
    s2, b2 = _folded_bn(keys[4], planes)
    s3, b3 = _folded_bn(keys[5], cout)
    return dict(w1=w1, w2=w2, w3=w3, s1=s1, b1=b1, s2=s2, b2=b2, s3=s3, b3=b3)


if __name__ == "__main__":
    # Bottleneck(inplanes=16, planes=4, stride=1, dilation=1, downsample=None)
    # Input is NCHW (2, 16, 16, 16), matching the PyTorch module's layout.
    N, Cin, H, W = 2, 16, 16, 16
    planes = 4

    key = jax.random.PRNGKey(0)
    kx, kp = jax.random.split(key)
    x_nchw = jax.random.normal(kx, (N, Cin, H, W), jnp.float32)
    params = make_params(kp, Cin, planes)

    x_nhwc = jnp.transpose(x_nchw, (0, 2, 3, 1))          # NCHW -> NHWC

    out = jax.block_until_ready(bottleneck_forward(x_nhwc, params))
    assert out.shape == (N, H, W, Cin)

    # Tight check against a reference that mirrors the kernel's bf16 recipe.
    ref16 = jax.block_until_ready(bottleneck_reference_bf16(x_nhwc, params))
    err16 = float(jnp.max(jnp.abs(out - ref16)))
    assert jnp.allclose(out, ref16, atol=2e-3, rtol=2e-3), f"bf16-ref err={err16}"

    # Loose check against the exact f32 module math (guards the folded recipe).
    ref32 = jax.block_until_ready(bottleneck_reference_f32(x_nhwc, params))
    err32 = float(jnp.max(jnp.abs(out - ref32)))
    assert jnp.allclose(out, ref32, atol=5e-2, rtol=5e-2), f"f32-ref err={err32}"

    _ = jnp.transpose(out, (0, 3, 1, 2))                  # back to NCHW if needed
    print("KERNEL_OK")
</pallas_src>

<mosaic_0001>
module attributes {stable_mosaic.version = 11 : i64} {
  func.func @kernel(%arg0: i32, %arg1: i32, %arg2: memref<2x16x16x128xbf16, #tpu.memory_space<any>>, %arg3: memref<128x128xbf16, #tpu.memory_space<vmem>>, %arg4: memref<1x128xf32, #tpu.memory_space<vmem>>, %arg5: memref<384x384xbf16, #tpu.memory_space<vmem>>, %arg6: memref<1x128xf32, #tpu.memory_space<vmem>>, %arg7: memref<128x128xbf16, #tpu.memory_space<vmem>>, %arg8: memref<1x128xf32, #tpu.memory_space<vmem>>, %arg9: memref<1x8x16x128xf32, #tpu.memory_space<vmem>>, %arg10: memref<10x16x128xbf16, #tpu.memory_space<vmem>>, %arg11: memref<3x!tpu.dma_semaphore, #tpu.memory_space<semaphore_mem>>) attributes {dimension_semantics = [#tpu.dimension_semantics<parallel>, #tpu.dimension_semantics<parallel>], iteration_bounds = array<i64: 2, 2>, scalar_prefetch = 0 : i64, scratch_operands = 2 : i64, tpu.core_type = #tpu.core_type<tc>, window_params = [{}, {pipeline_mode = #tpu.pipeline_mode<synchronous>, transform_indices = @transform_1, window_bounds = array<i64: 128, 128>}, {pipeline_mode = #tpu.pipeline_mode<synchronous>, transform_indices = @transform_2, window_bounds = array<i64: 1, 128>}, {pipeline_mode = #tpu.pipeline_mode<synchronous>, transform_indices = @transform_3, window_bounds = array<i64: 384, 384>}, {pipeline_mode = #tpu.pipeline_mode<synchronous>, transform_indices = @transform_4, window_bounds = array<i64: 1, 128>}, {pipeline_mode = #tpu.pipeline_mode<synchronous>, transform_indices = @transform_5, window_bounds = array<i64: 128, 128>}, {pipeline_mode = #tpu.pipeline_mode<synchronous>, transform_indices = @transform_6, window_bounds = array<i64: 1, 128>}, {transform_indices = @transform_7, window_bounds = array<i64: 1, 8, 16, 128>}]} {
    %c8_i32 = arith.constant 8 : i32
    %0 = arith.muli %arg1, %c8_i32 : i32
    %c0_i32 = arith.constant 0 : i32
    %c0_i32_0 = arith.constant 0 : i32
    %c0_i32_1 = arith.constant 0 : i32
    %1 = tpu.memref_slice %arg2[%arg0, %0, %c0_i32_0, %c0_i32_1] : memref<2x16x16x128xbf16, #tpu.memory_space<any>> -> memref<1x8x16x128xbf16, #tpu.memory_space<any>>
    %2 = tpu.memref_squeeze %1 : memref<1x8x16x128xbf16, #tpu.memory_space<any>> -> memref<8x16x128xbf16, #tpu.memory_space<any>>
    %c1_i32 = arith.constant 1 : i32
    %c0_i32_2 = arith.constant 0 : i32
    %c0_i32_3 = arith.constant 0 : i32
    %3 = tpu.memref_slice %arg10[%c1_i32, %c0_i32_2, %c0_i32_3] : memref<10x16x128xbf16, #tpu.memory_space<vmem>> -> memref<8x16x128xbf16, #tpu.memory_space<vmem>>
    %4 = tpu.memref_slice %arg11[%c0_i32] : memref<3x!tpu.dma_semaphore, #tpu.memory_space<semaphore_mem>> -> memref<1x!tpu.dma_semaphore, #tpu.memory_space<semaphore_mem>>
    %5 = tpu.memref_squeeze %4 : memref<1x!tpu.dma_semaphore, #tpu.memory_space<semaphore_mem>> -> memref<!tpu.dma_semaphore, #tpu.memory_space<semaphore_mem>>
    tpu.enqueue_dma source(%2 : memref<8x16x128xbf16, #tpu.memory_space<any>>) target(%3 : memref<8x16x128xbf16, #tpu.memory_space<vmem>>) target_semaphore(%5 : memref<!tpu.dma_semaphore, #tpu.memory_space<semaphore_mem>>)
    %c0_i32_4 = arith.constant 0 : i32
    %6 = arith.cmpi sgt, %arg1, %c0_i32_4 : i32
    %7 = arith.extui %6 : i1 to i32
    %c0_i32_5 = arith.constant 0 : i32
    %8 = arith.cmpi ne, %7, %c0_i32_5 : i32
    scf.if %8 {
      %c1_i32_54 = arith.constant 1 : i32
      %105 = arith.subi %0, %c1_i32_54 : i32
      %c1_i32_55 = arith.constant 1 : i32
      %c0_i32_56 = arith.constant 0 : i32
      %c0_i32_57 = arith.constant 0 : i32
      %106 = tpu.memref_slice %arg2[%arg0, %105, %c0_i32_56, %c0_i32_57] : memref<2x16x16x128xbf16, #tpu.memory_space<any>> -> memref<1x1x16x128xbf16, #tpu.memory_space<any>>
      %107 = tpu.memref_squeeze %106 : memref<1x1x16x128xbf16, #tpu.memory_space<any>> -> memref<1x16x128xbf16, #tpu.memory_space<any>>
      %c0_i32_58 = arith.constant 0 : i32
      %c0_i32_59 = arith.constant 0 : i32
      %c0_i32_60 = arith.constant 0 : i32
      %108 = tpu.memref_slice %arg10[%c0_i32_58, %c0_i32_59, %c0_i32_60] : memref<10x16x128xbf16, #tpu.memory_space<vmem>> -> memref<1x16x128xbf16, #tpu.memory_space<vmem>>
      %109 = tpu.memref_slice %arg11[%c1_i32_55] : memref<3x!tpu.dma_semaphore, #tpu.memory_space<semaphore_mem>> -> memref<1x!tpu.dma_semaphore, #tpu.memory_space<semaphore_mem>>
      %110 = tpu.memref_squeeze %109 : memref<1x!tpu.dma_semaphore, #tpu.memory_space<semaphore_mem>> -> memref<!tpu.dma_semaphore, #tpu.memory_space<semaphore_mem>>
      tpu.enqueue_dma source(%107 : memref<1x16x128xbf16, #tpu.memory_space<any>>) target(%108 : memref<1x16x128xbf16, #tpu.memory_space<vmem>>) target_semaphore(%110 : memref<!tpu.dma_semaphore, #tpu.memory_space<semaphore_mem>>)
    } else {
    }
    %c0_i32_6 = arith.constant 0 : i32
    %9 = arith.cmpi eq, %arg1, %c0_i32_6 : i32
    %10 = arith.extui %9 : i1 to i32
    %c0_i32_7 = arith.constant 0 : i32
    %11 = arith.cmpi ne, %10, %c0_i32_7 : i32
    scf.if %11 {
      %cst_54 = arith.constant 0.000000e+00 : bf16
      %105 = vector.broadcast %cst_54 : bf16 to vector<16x128xbf16>
      %c0_55 = arith.constant 0 : index
      %c0_56 = arith.constant 0 : index
      %c0_57 = arith.constant 0 : index
      %106 = vector.load %arg10[%c0_55, %c0_56, %c0_57] : memref<10x16x128xbf16, #tpu.memory_space<vmem>>, vector<1x16x128xbf16>
      %107 = vector.shape_cast %106 : vector<1x16x128xbf16> to vector<16x128xbf16>
      %108 = vector.shape_cast %105 : vector<16x128xbf16> to vector<1x16x128xbf16>
      tpu.vector_store %arg10[%c0_55, %c0_56, %c0_57], %108 {strides = array<i32>} : memref<10x16x128xbf16, #tpu.memory_space<vmem>>, vector<1x16x128xbf16>,
    } else {
    }
    %c1_i32_8 = arith.constant 1 : i32
    %12 = arith.cmpi slt, %arg1, %c1_i32_8 : i32
    %13 = arith.extui %12 : i1 to i32
    %c0_i32_9 = arith.constant 0 : i32
    %14 = arith.cmpi ne, %13, %c0_i32_9 : i32
    scf.if %14 {
      %c8_i32_54 = arith.constant 8 : i32
      %105 = arith.addi %0, %c8_i32_54 : i32
      %c2_i32 = arith.constant 2 : i32
      %c0_i32_55 = arith.constant 0 : i32
      %c0_i32_56 = arith.constant 0 : i32
      %106 = tpu.memref_slice %arg2[%arg0, %105, %c0_i32_55, %c0_i32_56] : memref<2x16x16x128xbf16, #tpu.memory_space<any>> -> memref<1x1x16x128xbf16, #tpu.memory_space<any>>
      %107 = tpu.memref_squeeze %106 : memref<1x1x16x128xbf16, #tpu.memory_space<any>> -> memref<1x16x128xbf16, #tpu.memory_space<any>>
      %c9_i32_57 = arith.constant 9 : i32
      %c0_i32_58 = arith.constant 0 : i32
      %c0_i32_59 = arith.constant 0 : i32
      %108 = tpu.memref_slice %arg10[%c9_i32_57, %c0_i32_58, %c0_i32_59] : memref<10x16x128xbf16, #tpu.memory_space<vmem>> -> memref<1x16x128xbf16, #tpu.memory_space<vmem>>
      %109 = tpu.memref_slice %arg11[%c2_i32] : memref<3x!tpu.dma_semaphore, #tpu.memory_space<semaphore_mem>> -> memref<1x!tpu.dma_semaphore, #tpu.memory_space<semaphore_mem>>
      %110 = tpu.memref_squeeze %109 : memref<1x!tpu.dma_semaphore, #tpu.memory_space<semaphore_mem>> -> memref<!tpu.dma_semaphore, #tpu.memory_space<semaphore_mem>>
      tpu.enqueue_dma source(%107 : memref<1x16x128xbf16, #tpu.memory_space<any>>) target(%108 : memref<1x16x128xbf16, #tpu.memory_space<vmem>>) target_semaphore(%110 : memref<!tpu.dma_semaphore, #tpu.memory_space<semaphore_mem>>)
    } else {
    }
    %c1_i32_10 = arith.constant 1 : i32
    %15 = arith.cmpi eq, %arg1, %c1_i32_10 : i32
    %16 = arith.extui %15 : i1 to i32
    %c0_i32_11 = arith.constant 0 : i32
    %17 = arith.cmpi ne, %16, %c0_i32_11 : i32
    scf.if %17 {
      %cst_54 = arith.constant 0.000000e+00 : bf16
      %105 = vector.broadcast %cst_54 : bf16 to vector<16x128xbf16>
      %c9 = arith.constant 9 : index
      %c0_55 = arith.constant 0 : index
      %c0_56 = arith.constant 0 : index
      %106 = vector.load %arg10[%c9, %c0_55, %c0_56] : memref<10x16x128xbf16, #tpu.memory_space<vmem>>, vector<1x16x128xbf16>
      %107 = vector.shape_cast %106 : vector<1x16x128xbf16> to vector<16x128xbf16>
      %108 = vector.shape_cast %105 : vector<16x128xbf16> to vector<1x16x128xbf16>
      tpu.vector_store %arg10[%c9, %c0_55, %c0_56], %108 {strides = array<i32>} : memref<10x16x128xbf16, #tpu.memory_space<vmem>>, vector<1x16x128xbf16>,
    } else {
    }
    %c0_i32_12 = arith.constant 0 : i32
    %c0_i32_13 = arith.constant 0 : i32
    %c0_i32_14 = arith.constant 0 : i32
    %18 = tpu.memref_slice %arg2[%arg0, %0, %c0_i32_13, %c0_i32_14] : memref<2x16x16x128xbf16, #tpu.memory_space<any>> -> memref<1x8x16x128xbf16, #tpu.memory_space<any>>
    %19 = tpu.memref_squeeze %18 : memref<1x8x16x128xbf16, #tpu.memory_space<any>> -> memref<8x16x128xbf16, #tpu.memory_space<any>>
    %c1_i32_15 = arith.constant 1 : i32
    %c0_i32_16 = arith.constant 0 : i32
    %c0_i32_17 = arith.constant 0 : i32
    %20 = tpu.memref_slice %arg10[%c1_i32_15, %c0_i32_16, %c0_i32_17] : memref<10x16x128xbf16, #tpu.memory_space<vmem>> -> memref<8x16x128xbf16, #tpu.memory_space<vmem>>
    %21 = tpu.memref_slice %arg11[%c0_i32_12] : memref<3x!tpu.dma_semaphore, #tpu.memory_space<semaphore_mem>> -> memref<1x!tpu.dma_semaphore, #tpu.memory_space<semaphore_mem>>
    %22 = tpu.memref_squeeze %21 : memref<1x!tpu.dma_semaphore, #tpu.memory_space<semaphore_mem>> -> memref<!tpu.dma_semaphore, #tpu.memory_space<semaphore_mem>>
    tpu.wait_dma2 semaphore(%22 : memref<!tpu.dma_semaphore, #tpu.memory_space<semaphore_mem>>) src(%19 : memref<8x16x128xbf16, #tpu.memory_space<any>>) dst(%20 : memref<8x16x128xbf16, #tpu.memory_space<vmem>>)
    %c0_i32_18 = arith.constant 0 : i32
    %23 = arith.cmpi sgt, %arg1, %c0_i32_18 : i32
    %24 = arith.extui %23 : i1 to i32
    %c0_i32_19 = arith.constant 0 : i32
    %25 = arith.cmpi ne, %24, %c0_i32_19 : i32
    scf.if %25 {
      %c1_i32_54 = arith.constant 1 : i32
      %105 = arith.subi %0, %c1_i32_54 : i32
      %c1_i32_55 = arith.constant 1 : i32
      %c0_i32_56 = arith.constant 0 : i32
      %c0_i32_57 = arith.constant 0 : i32
      %106 = tpu.memref_slice %arg2[%arg0, %105, %c0_i32_56, %c0_i32_57] : memref<2x16x16x128xbf16, #tpu.memory_space<any>> -> memref<1x1x16x128xbf16, #tpu.memory_space<any>>
      %107 = tpu.memref_squeeze %106 : memref<1x1x16x128xbf16, #tpu.memory_space<any>> -> memref<1x16x128xbf16, #tpu.memory_space<any>>
      %c0_i32_58 = arith.constant 0 : i32
      %c0_i32_59 = arith.constant 0 : i32
      %c0_i32_60 = arith.constant 0 : i32
      %108 = tpu.memref_slice %arg10[%c0_i32_58, %c0_i32_59, %c0_i32_60] : memref<10x16x128xbf16, #tpu.memory_space<vmem>> -> memref<1x16x128xbf16, #tpu.memory_space<vmem>>
      %109 = tpu.memref_slice %arg11[%c1_i32_55] : memref<3x!tpu.dma_semaphore, #tpu.memory_space<semaphore_mem>> -> memref<1x!tpu.dma_semaphore, #tpu.memory_space<semaphore_mem>>
      %110 = tpu.memref_squeeze %109 : memref<1x!tpu.dma_semaphore, #tpu.memory_space<semaphore_mem>> -> memref<!tpu.dma_semaphore, #tpu.memory_space<semaphore_mem>>
      tpu.wait_dma2 semaphore(%110 : memref<!tpu.dma_semaphore, #tpu.memory_space<semaphore_mem>>) src(%107 : memref<1x16x128xbf16, #tpu.memory_space<any>>) dst(%108 : memref<1x16x128xbf16, #tpu.memory_space<vmem>>)
    } else {
    }
    %c1_i32_20 = arith.constant 1 : i32
    %26 = arith.cmpi slt, %arg1, %c1_i32_20 : i32
    %27 = arith.extui %26 : i1 to i32
    %c0_i32_21 = arith.constant 0 : i32
    %28 = arith.cmpi ne, %27, %c0_i32_21 : i32
    scf.if %28 {
      %c8_i32_54 = arith.constant 8 : i32
      %105 = arith.addi %0, %c8_i32_54 : i32
      %c2_i32 = arith.constant 2 : i32
      %c0_i32_55 = arith.constant 0 : i32
      %c0_i32_56 = arith.constant 0 : i32
      %106 = tpu.memref_slice %arg2[%arg0, %105, %c0_i32_55, %c0_i32_56] : memref<2x16x16x128xbf16, #tpu.memory_space<any>> -> memref<1x1x16x128xbf16, #tpu.memory_space<any>>
      %107 = tpu.memref_squeeze %106 : memref<1x1x16x128xbf16, #tpu.memory_space<any>> -> memref<1x16x128xbf16, #tpu.memory_space<any>>
      %c9_i32_57 = arith.constant 9 : i32
      %c0_i32_58 = arith.constant 0 : i32
      %c0_i32_59 = arith.constant 0 : i32
      %108 = tpu.memref_slice %arg10[%c9_i32_57, %c0_i32_58, %c0_i32_59] : memref<10x16x128xbf16, #tpu.memory_space<vmem>> -> memref<1x16x128xbf16, #tpu.memory_space<vmem>>
      %109 = tpu.memref_slice %arg11[%c2_i32] : memref<3x!tpu.dma_semaphore, #tpu.memory_space<semaphore_mem>> -> memref<1x!tpu.dma_semaphore, #tpu.memory_space<semaphore_mem>>
      %110 = tpu.memref_squeeze %109 : memref<1x!tpu.dma_semaphore, #tpu.memory_space<semaphore_mem>> -> memref<!tpu.dma_semaphore, #tpu.memory_space<semaphore_mem>>
      tpu.wait_dma2 semaphore(%110 : memref<!tpu.dma_semaphore, #tpu.memory_space<semaphore_mem>>) src(%107 : memref<1x16x128xbf16, #tpu.memory_space<any>>) dst(%108 : memref<1x16x128xbf16, #tpu.memory_space<vmem>>)
    } else {
    }
    %c0 = arith.constant 0 : index
    %c0_22 = arith.constant 0 : index
    %c0_23 = arith.constant 0 : index
    %29 = vector.load %arg10[%c0, %c0_22, %c0_23] : memref<10x16x128xbf16, #tpu.memory_space<vmem>>, vector<10x16x128xbf16>
    %cst = arith.constant 0.000000e+00 : bf16
    %30 = vector.broadcast %cst : bf16 to vector<10x16x128xbf16>
    %31 = arith.maximumf %29, %30 : vector<10x16x128xbf16>
    %32 = vector.shape_cast %31 : vector<10x16x128xbf16> to vector<160x128xbf16>
    %c0_24 = arith.constant 0 : index
    %c0_25 = arith.constant 0 : index
    %33 = vector.load %arg3[%c0_24, %c0_25] : memref<128x128xbf16, #tpu.memory_space<vmem>>, vector<128x128xbf16>
    %cst_26 = arith.constant dense<0.000000e+00> : vector<160x128xf32>
    %34 = tpu.matmul %32, %33, %cst_26 {dimension_numbers = #tpu.dot_dimension_numbers<[1], [0], [0], [1], [0, 0, 1, 1], [], []>} : vector<160x128xbf16>, vector<128x128xbf16>, vector<160x128xf32> -> vector<160x128xf32>
    %35 = vector.shape_cast %34 : vector<160x128xf32> to vector<10x16x128xf32>
    %c0_27 = arith.constant 0 : index
    %c0_28 = arith.constant 0 : index
    %36 = vector.load %arg4[%c0_27, %c0_28] : memref<1x128xf32, #tpu.memory_space<vmem>>, vector<1x128xf32>
    %37 = vector.shape_cast %36 : vector<1x128xf32> to vector<1x1x128xf32>
    %38 = vector.broadcast %37 : vector<1x1x128xf32> to vector<10x16x128xf32>
    %39 = arith.addf %35, %38 : vector<10x16x128xf32>
    %cst_29 = arith.constant 0.000000e+00 : f32
    %40 = vector.broadcast %cst_29 : f32 to vector<10x16x128xf32>
    %41 = arith.maximumf %39, %40 : vector<10x16x128xf32>
    %42 = tpu.iota {dimensions = array<i32: 0>} : vector<10x1x1xi32>
    %c0_i32_30 = arith.constant 0 : i32
    %43 = vector.broadcast %c0_i32_30 : i32 to vector<10x1x1xi32>
    %44 = arith.cmpi eq, %42, %43 : vector<10x1x1xi32>
    %c0_i32_31 = arith.constant 0 : i32
    %45 = arith.cmpi eq, %arg1, %c0_i32_31 : i32
    %46 = vector.broadcast %45 : i1 to vector<10x1x1xi1>
    %47 = arith.andi %44, %46 : vector<10x1x1xi1>
    %c9_i32 = arith.constant 9 : i32
    %48 = vector.broadcast %c9_i32 : i32 to vector<10x1x1xi32>
    %49 = arith.cmpi eq, %42, %48 : vector<10x1x1xi32>
    %c1_i32_32 = arith.constant 1 : i32
    %50 = arith.cmpi eq, %arg1, %c1_i32_32 : i32
    %51 = vector.broadcast %50 : i1 to vector<10x1x1xi1>
    %52 = arith.andi %49, %51 : vector<10x1x1xi1>
    %53 = arith.ori %47, %52 : vector<10x1x1xi1>
    %cst_33 = arith.constant 0.000000e+00 : f32
    %54 = vector.shape_cast %53 : vector<10x1x1xi1> to vector<10x1x1xi1>
    %55 = vector.broadcast %54 : vector<10x1x1xi1> to vector<10x16x128xi1>
    %56 = vector.broadcast %cst_33 : f32 to vector<10x16x128xf32>
    %57 = arith.select %55, %56, %41 : vector<10x16x128xi1>, vector<10x16x128xf32>
    %58 = tpu.iota {dimensions = array<i32: 1>} : vector<1x16x1xi32>
    %c1_i32_34 = arith.constant 1 : i32
    %59 = vector.broadcast %c1_i32_34 : i32 to vector<1x16x1xi32>
    %60 = arith.cmpi sge, %58, %59 : vector<1x16x1xi32>
    %c1_i32_35 = arith.constant 1 : i32
    %61 = tpu.dynamic_rotate %57 by %c1_i32_35 dim 1 : vector<10x16x128xf32>, i32 -> vector<10x16x128xf32>
    %cst_36 = arith.constant 0.000000e+00 : f32
    %62 = vector.shape_cast %60 : vector<1x16x1xi1> to vector<1x16x1xi1>
    %63 = vector.broadcast %62 : vector<1x16x1xi1> to vector<10x16x128xi1>
    %64 = vector.broadcast %cst_36 : f32 to vector<10x16x128xf32>
    %65 = arith.select %63, %61, %64 : vector<10x16x128xi1>, vector<10x16x128xf32>
    %c15_i32 = arith.constant 15 : i32
    %66 = vector.broadcast %c15_i32 : i32 to vector<1x16x1xi32>
    %67 = arith.cmpi slt, %58, %66 : vector<1x16x1xi32>
    %c15_i32_37 = arith.constant 15 : i32
    %68 = tpu.dynamic_rotate %57 by %c15_i32_37 dim 1 : vector<10x16x128xf32>, i32 -> vector<10x16x128xf32>
    %cst_38 = arith.constant 0.000000e+00 : f32
    %69 = vector.shape_cast %67 : vector<1x16x1xi1> to vector<1x16x1xi1>
    %70 = vector.broadcast %69 : vector<1x16x1xi1> to vector<10x16x128xi1>
    %71 = vector.broadcast %cst_38 : f32 to vector<10x16x128xf32>
    %72 = arith.select %70, %68, %71 : vector<10x16x128xi1>, vector<10x16x128xf32>
    %73 = tpu.concatenate %65, %57, %72 in 2 : vector<10x16x128xf32>, vector<10x16x128xf32>, vector<10x16x128xf32> -> vector<10x16x384xf32>
    %74 = arith.truncf %73 : vector<10x16x384xf32> to vector<10x16x384xbf16>
    %75 = vector.shape_cast %74 : vector<10x16x384xbf16> to vector<160x384xbf16>
    %c0_39 = arith.constant 0 : index
    %c0_40 = arith.constant 0 : index
    %76 = vector.load %arg5[%c0_39, %c0_40] : memref<384x384xbf16, #tpu.memory_space<vmem>>, vector<384x384xbf16>
    %cst_41 = arith.constant dense<0.000000e+00> : vector<160x384xf32>
    %77 = tpu.matmul %75, %76, %cst_41 {dimension_numbers = #tpu.dot_dimension_numbers<[1], [0], [0], [1], [0, 0, 1, 1], [], []>} : vector<160x384xbf16>, vector<384x384xbf16>, vector<160x384xf32> -> vector<160x384xf32>
    %78 = vector.shape_cast %77 : vector<160x384xf32> to vector<10x16x384xf32>
    %79 = vector.extract_strided_slice %78 {offsets = [0, 0, 0], sizes = [8, 16, 128], strides = [1, 1, 1]} : vector<10x16x384xf32> to vector<8x16x128xf32>
    %80 = vector.extract_strided_slice %78 {offsets = [1, 0, 128], sizes = [8, 16, 128], strides = [1, 1, 1]} : vector<10x16x384xf32> to vector<8x16x128xf32>
    %81 = arith.addf %79, %80 : vector<8x16x128xf32>
    %82 = vector.extract_strided_slice %78 {offsets = [2, 0, 256], sizes = [8, 16, 128], strides = [1, 1, 1]} : vector<10x16x384xf32> to vector<8x16x128xf32>
    %83 = arith.addf %81, %82 : vector<8x16x128xf32>
    %c0_42 = arith.constant 0 : index
    %c0_43 = arith.constant 0 : index
    %84 = vector.load %arg6[%c0_42, %c0_43] : memref<1x128xf32, #tpu.memory_space<vmem>>, vector<1x128xf32>
    %85 = vector.shape_cast %84 : vector<1x128xf32> to vector<1x1x128xf32>
    %86 = vector.broadcast %85 : vector<1x1x128xf32> to vector<8x16x128xf32>
    %87 = arith.addf %83, %86 : vector<8x16x128xf32>
    %cst_44 = arith.constant 0.000000e+00 : f32
    %88 = vector.broadcast %cst_44 : f32 to vector<8x16x128xf32>
    %89 = arith.maximumf %87, %88 : vector<8x16x128xf32>
    %90 = vector.shape_cast %89 : vector<8x16x128xf32> to vector<128x128xf32>
    %91 = arith.truncf %90 : vector<128x128xf32> to vector<128x128xbf16>
    %c0_45 = arith.constant 0 : index
    %c0_46 = arith.constant 0 : index
    %92 = vector.load %arg7[%c0_45, %c0_46] : memref<128x128xbf16, #tpu.memory_space<vmem>>, vector<128x128xbf16>
    %cst_47 = arith.constant dense<0.000000e+00> : vector<128x128xf32>
    %93 = tpu.matmul %91, %92, %cst_47 {dimension_numbers = #tpu.dot_dimension_numbers<[1], [0], [0], [1], [0, 0, 1, 1], [], []>} : vector<128x128xbf16>, vector<128x128xbf16>, vector<128x128xf32> -> vector<128x128xf32>
    %94 = vector.shape_cast %93 : vector<128x128xf32> to vector<8x16x128xf32>
    %c0_48 = arith.constant 0 : index
    %c0_49 = arith.constant 0 : index
    %95 = vector.load %arg8[%c0_48, %c0_49] : memref<1x128xf32, #tpu.memory_space<vmem>>, vector<1x128xf32>
    %96 = vector.shape_cast %95 : vector<1x128xf32> to vector<1x1x128xf32>
    %97 = vector.broadcast %96 : vector<1x1x128xf32> to vector<8x16x128xf32>
    %98 = arith.addf %94, %97 : vector<8x16x128xf32>
    %99 = vector.extract_strided_slice %31 {offsets = [1, 0, 0], sizes = [8, 16, 128], strides = [1, 1, 1]} : vector<10x16x128xbf16> to vector<8x16x128xbf16>
    %100 = arith.extf %99 : vector<8x16x128xbf16> to vector<8x16x128xf32>
    %101 = arith.addf %98, %100 : vector<8x16x128xf32>
    %c0_50 = arith.constant 0 : index
    %c0_51 = arith.constant 0 : index
    %c0_52 = arith.constant 0 : index
    %c0_53 = arith.constant 0 : index
    %102 = vector.load %arg9[%c0_50, %c0_51, %c0_52, %c0_53] : memref<1x8x16x128xf32, #tpu.memory_space<vmem>>, vector<1x8x16x128xf32>
    %103 = vector.shape_cast %102 : vector<1x8x16x128xf32> to vector<8x16x128xf32>
    %104 = vector.shape_cast %101 : vector<8x16x128xf32> to vector<1x8x16x128xf32>
    tpu.vector_store %arg9[%c0_50, %c0_51, %c0_52, %c0_53], %104 {strides = array<i32>} : memref<1x8x16x128xf32, #tpu.memory_space<vmem>>, vector<1x8x16x128xf32>,
    return
  }
  func.func @transform_1(%arg0: i32, %arg1: i32) -> (i32, i32) {
    %c0_i32 = arith.constant 0 : i32
    %c0_i32_0 = arith.constant 0 : i32
    %c0_i32_1 = arith.constant 0 : i32
    return %c0_i32, %c0_i32_0 : i32, i32
  }
  func.func @transform_2(%arg0: i32, %arg1: i32) -> (i32, i32) {
    %c0_i32 = arith.constant 0 : i32
    %c0_i32_0 = arith.constant 0 : i32
    %c0_i32_1 = arith.constant 0 : i32
    return %c0_i32, %c0_i32_0 : i32, i32
  }
  func.func @transform_3(%arg0: i32, %arg1: i32) -> (i32, i32) {
    %c0_i32 = arith.constant 0 : i32
    %c0_i32_0 = arith.constant 0 : i32
    %c0_i32_1 = arith.constant 0 : i32
    return %c0_i32, %c0_i32_0 : i32, i32
  }
  func.func @transform_4(%arg0: i32, %arg1: i32) -> (i32, i32) {
    %c0_i32 = arith.constant 0 : i32
    %c0_i32_0 = arith.constant 0 : i32
    %c0_i32_1 = arith.constant 0 : i32
    return %c0_i32, %c0_i32_0 : i32, i32
  }
  func.func @transform_5(%arg0: i32, %arg1: i32) -> (i32, i32) {
    %c0_i32 = arith.constant 0 : i32
    %c0_i32_0 = arith.constant 0 : i32
    %c0_i32_1 = arith.constant 0 : i32
    return %c0_i32, %c0_i32_0 : i32, i32
  }
  func.func @transform_6(%arg0: i32, %arg1: i32) -> (i32, i32) {
    %c0_i32 = arith.constant 0 : i32
    %c0_i32_0 = arith.constant 0 : i32
    %c0_i32_1 = arith.constant 0 : i32
    return %c0_i32, %c0_i32_0 : i32, i32
  }
  func.func @transform_7(%arg0: i32, %arg1: i32) -> (i32, i32, i32, i32) {
    %c0_i32 = arith.constant 0 : i32
    %c0_i32_0 = arith.constant 0 : i32
    %c0_i32_1 = arith.constant 0 : i32
    return %arg0, %arg1, %c0_i32, %c0_i32_0 : i32, i32, i32, i32
  }
}

</mosaic_0001>

<bundles_post_ra>
// kernel: tpu_custom_call.1
= control target key start
LH: loop header
LB: loop body
LE: loop exit
PB: predicated region body
PF: predicated region fallthrough
CT: control target
= control target key end

     0   :  { %s4428_s0 = inlined_call_operand.hbm [shape: bf16[2,16,16,128], index: 0, kind: input, shape index: {}]   ;;  %s4429_s1 = inlined_call_operand.hbm [shape: bf16[128,128], index: 1, kind: input, shape index: {}]   ;;  %s4430_s2 = inlined_call_operand.vmem [shape: f32[1,128], index: 2, kind: input, shape index: {}]   ;;  %s4431_s3 = inlined_call_operand.hbm [shape: bf16[384,384], index: 3, kind: input, shape index: {}]   ;;  %s4432_s4 = inlined_call_operand.vmem [shape: f32[1,128], index: 4, kind: input, shape index: {}]   ;;  %s4433_s5 = inlined_call_operand.hbm [shape: bf16[128,128], index: 5, kind: input, shape index: {}]   ;;  %s4434_s6 = inlined_call_operand.vmem [shape: f32[1,128], index: 6, kind: input, shape index: {}]   ;;  %s4435_s7 = inlined_call_operand.hbm [shape: f32[2,16,16,128], index: 7, kind: output, shape index: {}]  }
   0x1   :  { %4459 = sst [smem:[#allocation52_spill]] %s4431_s3 }
   0x2   :  { %12 = vsyncpa [#allocation5], 0 }
   0x3   :  { %13 = vsyncpa [#allocation8], 0 }
   0x4   :  { %14 = vsyncpa [#allocation6], 0 }
   0x5   :  { %16 = vsyncpa [#allocation6 + $0x1], 0  ;;  %s3477_s24 = smov 0   ;;  %s3479_s25 = smov 0  }
   0x6   :  { %s3481_s26 = smov 0   ;;  %s3483_s27 = smov 0  }
   0x7   :  { %s3485_s28 = smov 0   ;;  %s3487_s29 = smov 0  }
   0x8   :  { %s3489_s30 = smov 0   ;;  %s3491_s8 = smov 0  }
   0x9 LB: > { %4460 = sst [smem:[#allocation25_spill]] %s3393_s24  ;;  %s2457_s9 = sadd.s32 4294967295, %s3421_s8   ;;  %s3421_s8 = sphi %s3491_s8, %s22_s8   ;;  %s3417_s30 = sphi %s3489_s30, %s4521_s30   ;;  %s3413_s29 = sphi %s3487_s29, %s4520_s29   ;;  %s3409_s28 = sphi %s3485_s28, %s4524_s28   ;;  %s3405_s27 = sphi %s3483_s27, %s4518_s27   ;;  %s3401_s26 = sphi %s3481_s26, %s4517_s26   ;;  %s3397_s25 = sphi %s3479_s25, %s4523_s25   ;;  %s3393_s24 = sphi %s3477_s24, %s4522_s24  }
   0xa   : > { %4461 = sst [smem:[#allocation26_spill]] %s3401_s26  ;;  %s2458_s10 = sadd.s32 4294967294, %s3421_s8  }
   0xb   : > { %4462 = sst [smem:[#allocation27_spill]] %s3413_s29  ;;  %s31_s11 = sadd.s32 1, %s3413_s29 }
   0xc   : > { %4463 = sst [smem:[#allocation28_spill]] %s3417_s30  ;;  %s34_s12 = sadd.s32 1, %s3417_s30 }
   0xd   : > { %p32_p0 = scmp.ge.s32.totalorder %s31_s11, 2  ;;  %s169_s13 = sadd.s32 1, %s3401_s26 }
   0xe   : > { %p179_p1 = scmp.ne.s32.totalorder %s3401_s26, %s3397_s25  ;;  %p180_p2 = scmp.eq.s32.totalorder %s2457_s9, 3 }
   0xf   : > { %s4526_s11 = smov (%p32_p0, %s31_s11), 0  ;;  %s4528_s12 = smov (!%p32_p0, %s34_s12), %s3417_s30 }
  0x10   : > { %4464 = sst [smem:[#allocation29_spill]] %s4526_s11  ;;  %s165_s14 = ssub.s32 %s3413_s29, %s4526_s11 }
  0x11   : > { %p3529_p3 = por %p180_p2, %p179_p1  ;;  %p36_p4 = scmp.ge.s32.totalorder %s4528_s12, 2 }
  0x12   : > { %p185_p5 = scmp.ne.s32.totalorder %s3397_s25, %s3393_s24  ;;  %p186_p6 = scmp.eq.s32.totalorder %s2458_s10, 3 }
  0x13   : > { %p2459_p7 = scmp.ge.s32.totalorder %s3421_s8, 1  ;;  %s4530_s12 = smov (%p36_p4, %s4528_s12), 0 }
  0x14   : > { %4466 = sst [smem:[#allocation30_spill]] %s4530_s12  ;;  %p3538_p8 = por %p186_p6, %p185_p5 }
  0x15   : > { %p193_p9 = scmp.lt.s32.totalorder %s3421_s8, 5  ;;  %s164_s17 = ssub.s32 %s3417_s30, %s4530_s12 }
  0x16   : > { %s4467_s16 = scalar_select %p3538_p8, 1, 0 }
  0x17   : > { %s166_s18 = sor.u32 %s165_s14, %s164_s17  ;;  %p3545_p10 = pnand %p2459_p7, %p193_p9 }
  0x18   : > { %4468 = sst [smem:[#allocation31_spill]] %s4467_s16  ;;  %p167_p11 = scmp.eq.s32.totalorder %s166_s18, 0 }
  0x19   : > { %p3549_p12 = scmp.eq.s32.totalorder %s2457_s9, 0  ;;  %p3033_p13 = pneg %p3545_p10 }
  0x1a   : > { %s4471_s3 = sld [smem:[#allocation52_spill]]  ;;  %s3423_s9 = smov [#allocation7]  }
  0x1b   : > { %s3559_s10 = scalar_select %p167_p11, %s3401_s26, %s169_s13  }
  0x1c   : > { %p3563_p0 = pnand %p3549_p12, %p3033_p13  ;;  %s223_s17 = sshll.u32 %s3423_s9, 4  ;;  %s224_s17 = int_to_ptr.vmem [resolvable:$true] %s223_s17 }
  0x1d   : > { %4472 = sst [smem:[#allocation32_spill]] %s3559_s10  ;;  %s3424_s18 = smov 192  }
  0x1e   : > { %s3425_s12 = smov 12   ;;  %s204_s13 = sshll.u32 %s4429_s1, 4  ;;  %s205_s13 = int_to_ptr.hbm [resolvable:$true] %s204_s13 }
  0x1f   : > { %s238_s10 = sshll.u32 %s4433_s5, 4  ;;  %s3427_s26 = smov 64   ;;  %s239_s10 = int_to_ptr.hbm [resolvable:$true] %s238_s10 }
  0x20   : > { %s221_s23 = sshll.u32 %s4471_s3, 4  ;;  %s3426_s3 = smov [#allocation4]   ;;  %s222_s23 = int_to_ptr.hbm [resolvable:$true] %s221_s23 }
  0x21   : > { %3039 = dma.hbm_to_vmem [thread:$0]  (!%p3563_p0), %s222_s23, 9216, %s224_s17, [#allocation8], %s3424_s18, %s3424_s18, %s3425_s12  }
  0x22   : > { %s206_s11 = sshll.u32 %s3426_s3, 4  ;;  %s3428_s9 = smov 4   ;;  %s207_s11 = int_to_ptr.vmem [resolvable:$true] %s206_s11 }
  0x23   : > { %3036 = dma.hbm_to_vmem [thread:$0]  (!%p3563_p0), %s205_s13, 1024, %s207_s11, [#allocation5], %s3427_s26, %s3427_s26, %s3428_s9  }
  0x24   : > { %s3429_s16 = smov [#allocation9]   ;;  %259 = sbr.rel (%p3545_p10) target bundleno = 1006 (0x3ee), region = 44 }
  0x25   : > { %s240_s24 = sshll.u32 %s3429_s16, 4  ;;  %s241_s24 = int_to_ptr.vmem [resolvable:$true] %s240_s24 }
  0x26   : > { %3042 = dma.hbm_to_vmem [thread:$0]  (!%p3563_p0), %s239_s10, 1024, %s241_s24, [#allocation8], %s3427_s26, %s3427_s26, %s3428_s9  }
  0x29   : > { %3370 = dma.done.wait (%p3549_p12), [#allocation5], 1024  }
  0x2a   : > { %3372 = vsyncadd (%p3549_p12), [#allocation5], 4294966272 }
  0x2b   : > { %3374 = dma.done.wait (%p3549_p12), [#allocation8], 10240  }
  0x2c   : > { %3376 = vsyncadd (%p3549_p12), [#allocation8], 4294957056  ;;  %s292_s3 = sand.u32 1, %s3397_s25   ;;  %s2468_s24 = sshll.u32 %s3405_s27, 3 }
  0x2d   : > { %s3593_s26 = sshll.u32 %s292_s3, 7  ;;  %s2847_s29 = sshll.u32 %s3405_s27, 4 }
  0x2e   : > { %s2470_s30 = sshll.u32 %s3409_s28, 5  ;;  %s3430_s16 = smov [#allocation2 + $0x8]  }
  0x2f   : > { %s3597_s11 = sadd.s32 %s2847_s29, %s2470_s30  ;;  %s313_s19 = sshll.u32 %s3430_s16, 4  ;;  %s314_s19 = int_to_ptr.vmem [resolvable:$true] %s313_s19 }
  0x30   : > { %s2471_s12 = sshll.u32 %s3597_s11, 2  ;;  %s2473_s17 = sadd.s32 4294967295, %s2468_s24 }
  0x31   : > { %s3603_s10 = scalar_lea.hbm %s4428_s0, %s2471_s12  ;;  %s2474_s18 = sshll.u32 %s2473_s17, 1 }
  0x32   : > { %s311_s14 = sshll.u32 %s3603_s10, 4  ;;  %s3609_s9 = scalar_lea.hbm %s4428_s0, 256  ;;  %s312_s14 = int_to_ptr.hbm [resolvable:$true] %s311_s14 }
  0x33   : > { %s3229_s21 = sshra.s32 %s312_s14, 4  ;;  %s3230_s21 = int_to_ptr.hbm [resolvable:$true] %s3229_s21 }
  0x34   : > { %s3231_s28 = scalar_lea.hbm %s3230_s21, 64  ;;  %p3234_p2 = scmp.lt.s32.totalorder %s3230_s21, %s4428_s0 }
  0x35   : > { %p3232_p1 = scmp.ne.s32.totalorder %s3230_s21, %s3231_s28  ;;  %p3235_p4 = scmp.lt.s32.totalorder %s3609_s9, %s3231_s28 }
  0x37   : > { %p3236_p5 = por %p3235_p4, %p3234_p2 }
  0x39   : > { %p3237_p6 = pnand %p3236_p5, %p3232_p1 }
  0x3b   : > { %3240 = shalt.err (!%p3237_p6)  }
  0x3c   : > { %316 = dma.hbm_to_vmem [thread:$0]  %s312_s14, 1024, %s314_s19, [#allocation3] }
  0x3d   : > { %s323_s24 = sadd.s32 %s2474_s18, %s2470_s30  ;;  %p3053_p7 = scmp.gt.s32.totalorder %s3405_s27, 0 }
  0x3e   : > { %s2475_s12 = sshll.u32 %s323_s24, 2  ;;  %s3431_s13 = smov [#allocation2]  }
  0x3f   : > { %s325_s17 = scalar_lea.hbm %s4428_s0, %s2475_s12  ;;  %s336_s29 = sshll.u32 %s3431_s13, 4  ;;  %s337_s29 = int_to_ptr.vmem [resolvable:$true] %s336_s29 }
  0x40   : > { %s334_s22 = sshll.u32 %s325_s17, 4  ;;  %s335_s22 = int_to_ptr.hbm [resolvable:$true] %s334_s22 }
  0x41   : > { %s3253_s21 = sshra.s32 %s335_s22, 4  ;;  %s3254_s21 = int_to_ptr.hbm [resolvable:$true] %s3253_s21 }
  0x42   : > { %s3255_s28 = scalar_lea.hbm %s3254_s21, 8  ;;  %p3260_p12 = scmp.lt.s32.totalorder %s3254_s21, %s4428_s0 }
  0x43   : > { %p3256_p9 = scmp.ne.s32.totalorder %s3254_s21, %s3255_s28  ;;  %p3261_p13 = scmp.lt.s32.totalorder %s3609_s9, %s3255_s28 }
  0x45   : > { %p3257_p10 = pnand %p3256_p9, %p3053_p7  ;;  %p3262_p0 = por %p3261_p13, %p3260_p12 }
  0x47   : > { %p3258_p11 = pneg %p3257_p10 }
  0x49   : > { %p3263_p1 = pnand %p3262_p0, %p3258_p11 }
  0x4b   : > { %3266 = shalt.err (!%p3263_p1)  }
  0x4c   : > { %3024 = dma.hbm_to_vmem [thread:$0]  (%p3053_p7), %s335_s22, 128, %s337_s29, [#allocation3 + $0x1] }
  0x4d   : > { %p340_p2 = scmp.eq.s32.totalorder %s3405_s27, 0  ;;  %s3629_s14 = scalar_lea.vmem [#allocation10], %s3593_s26 }
  0x4e   : > { %p2476_p4 = scmp.ne.s32.totalorder %s3405_s27, 0 }
  0x50   : > { %343 = sbr.rel (%p2476_p4) target bundleno = 88 (0x58), region = 72 }
  0x55   : > { %v3432_v0 = vmov 0  }
  0x56   : > { %344 = vst [vmem:[#allocation2] sm:$0xf] %v3432_v0 }
  0x57   : > { %345 = vst [vmem:[#allocation2 + $0x4] sm:$0xf] %v3432_v0 }
  0x58 PF: > { %p3054_p5 = scmp.lt.s32.totalorder %s3405_s27, 1  ;;  %s2392_s18 = scalar_lea.hbm %s3603_s10, 64 }
  0x59   : > { %s364_s16 = sshll.u32 %s2392_s18, 4  ;;  %s3433_s24 = smov [#allocation2 + $0x48]   ;;  %s365_s16 = int_to_ptr.hbm [resolvable:$true] %s364_s16 }
  0x5a   : > { %s366_s12 = sshll.u32 %s3433_s24, 4  ;;  %s3281_s26 = sshra.s32 %s365_s16, 4  ;;  %s367_s12 = int_to_ptr.vmem [resolvable:$true] %s366_s12  ;;  %s3282_s26 = int_to_ptr.hbm [resolvable:$true] %s3281_s26 }
  0x5b   : > { %s3283_s20 = scalar_lea.hbm %s3282_s26, 8  ;;  %p3288_p11 = scmp.lt.s32.totalorder %s3282_s26, %s4428_s0 }
  0x5c   : > { %p3284_p6 = scmp.ne.s32.totalorder %s3282_s26, %s3283_s20  ;;  %p3289_p12 = scmp.lt.s32.totalorder %s3609_s9, %s3283_s20 }
  0x5e   : > { %p3285_p9 = pnand %p3284_p6, %p3054_p5  ;;  %p3290_p13 = por %p3289_p12, %p3288_p11 }
  0x60   : > { %p3286_p10 = pneg %p3285_p9 }
  0x62   : > { %p3291_p0 = pnand %p3290_p13, %p3286_p10 }
  0x64   : > { %3294 = shalt.err (!%p3291_p0)  }
  0x65   : > { %3026 = dma.hbm_to_vmem [thread:$0]  (%p3054_p5), %s365_s16, 128, %s367_s12, [#allocation3 + $0x2] }
  0x66   : > { %p370_p1 = scmp.eq.s32.totalorder %s3405_s27, 1  ;;  %p2482_p4 = scmp.ne.s32.totalorder %s3405_s27, 1 }
  0x68   : > { %373 = sbr.rel (%p2482_p4) target bundleno = 112 (0x70), region = 84 }
  0x6d   : > { %v3434_v1 = vmov 0  }
  0x6e   : > { %375 = vst [vmem:[#allocation2 + $0x48] sm:$0xf] %v3434_v1 }
  0x6f   : > { %376 = vst [vmem:[#allocation2 + $0x4c] sm:$0xf] %v3434_v1 }
  0x70 PF: > { %3377 = dma.done.wait [#allocation3], 1024 }
  0x71   : > { %3378 = vsyncadd [#allocation3], 4294966272 }
  0x72   : > { %3380 = dma.done.wait (%p3053_p7), [#allocation3 + $0x1], 128 }
  0x73   : > { %3382 = vsyncadd (%p3053_p7), [#allocation3 + $0x1], 4294967168 }
  0x74   : > { %3384 = dma.done.wait (%p3054_p5), [#allocation3 + $0x2], 128 }
  0x75   : > { %3386 = vsyncadd (%p3054_p5), [#allocation3 + $0x2], 4294967168  ;;  %v2856_v2 = vld [vmem:[#allocation4 + $0x38] sm:$0xff]  ;;  %v2855_v3 = vld [vmem:[#allocation4 + $0x30] sm:$0xff]  ;;  %s707_s22 = scalar_select %p340_p2, 1, 0 }
  0x76   : > { %604 = vmatpush.bf16.msra.mxu0 %v2856_v2  ;;  %2987 = vmatpush.bf16.msra.mxu3 %v2856_v2  ;;  %v2854_v4 = vld [vmem:[#allocation4 + $0x28] sm:$0xff]  ;;  %v2853_v5 = vld [vmem:[#allocation4 + $0x20] sm:$0xff]  ;;  %v2939_v6 = vld [vmem:[#allocation2] sm:$0xff]   ;;  %s3786_s13 = scalar_select %p370_p1, 1, 0 }
  0x77   : > { %v2984_v7 = vld [vmem:[#allocation2 + $0x38] sm:$0xff]   ;;  %v2940_v8 = vunpack.c.l.bf16 %v2939_v6  ;;  %v2941_v9 = vunpack.c.h.bf16 %v2939_v6  ;;  %v2852_v12 = vld [vmem:[#allocation4 + $0x18] sm:$0xff]  ;;  %v2851_v17 = vld [vmem:[#allocation4 + $0x10] sm:$0xff]  ;;  %s2841_s30 = sshll.u32 %s3597_s11, 3  ;;  %s2322_s24 = sshll.u32 %s3629_s14, 4  ;;  %s2323_s24 = int_to_ptr.vmem [resolvable:$true] %s2322_s24 }
  0x78   : > { %v2968_v10 = vunpack.c.l.bf16 %v2984_v7  ;;  %v2969_v11 = vunpack.c.h.bf16 %v2984_v7  ;;  %v2850_v22 = vld [vmem:[#allocation4 + $0x8] sm:$0xff]  ;;  %v2978_v27 = vld [vmem:[#allocation2 + $0x8] sm:$0xff]   ;;  %v2985_v28 = vld [vmem:[#allocation2 + $0x40] sm:$0xff]   ;;  %s2321_s16 = scalar_lea.hbm %s4435_s7, %s2841_s30  ;;  %s2307_s11 = scalar_lea.sflag [#allocation6], %s292_s3 }
  0x79   : > { %v440_v13 = vmax.f32 %v2940_v8, 0.0  ;;  %v441_v14 = vmax.f32 %v2941_v9, 0.0  ;;  %v2849_v29 = vld [vmem:[#allocation4] sm:$0xff]  ;;  %v2944_v30 = vunpack.c.l.bf16 %v2978_v27  ;;  %v2945_v31 = vunpack.c.h.bf16 %v2978_v27  ;;  %v2986_v49 = vld [vmem:[#allocation2 + $0x48] sm:$0xff]   ;;  %s2324_s12 = sshll.u32 %s2321_s16, 4  ;;  %s3329_s10 = scalar_lea.hbm %s4435_s7, 512  ;;  %s2325_s12 = int_to_ptr.hbm [resolvable:$true] %s2324_s12 }
  0x7a   : > { %605 = vmatpush.bf16.msra.mxu0 %v2855_v3  ;;  %2988 = vmatpush.bf16.msra.mxu3 %v2855_v3  ;;  %v454_v15 = vmax.f32 %v2968_v10, 0.0  ;;  %v455_v16 = vmax.f32 %v2969_v11, 0.0  ;;  %v2972_v32 = vunpack.c.l.bf16 %v2985_v28  ;;  %v2973_v33 = vunpack.c.h.bf16 %v2985_v28  ;;  %v2979_v48 = vld [vmem:[#allocation2 + $0x10] sm:$0xff]   ;;  %v2982_v27 = vld [vmem:[#allocation2 + $0x28] sm:$0xff]   ;;  %s3323_s26 = sshra.s32 %s2325_s12, 4  ;;  %s3324_s26 = int_to_ptr.hbm [resolvable:$true] %s3323_s26 }
  0x7b   : > { %v460_v18 = vpack.c.bf16 %v440_v13, %v440_v13  ;;  %v461_v19 = vpack.c.bf16 %v441_v14, %v441_v14  ;;  %v442_v36 = vmax.f32 %v2944_v30, 0.0  ;;  %v443_v37 = vmax.f32 %v2945_v31, 0.0  ;;  %s3325_s20 = scalar_lea.hbm %s3324_s26, 128  ;;  %p3330_p6 = scmp.lt.s32.totalorder %s3324_s26, %s4435_s7 }
  0x7c   : > { %v3652_v20 = vpack.c.bf16 %v454_v15, %v454_v15  ;;  %v3654_v21 = vpack.c.bf16 %v455_v16, %v455_v16  ;;  %v456_v38 = vmax.f32 %v2972_v32, 0.0  ;;  %v457_v39 = vmax.f32 %v2973_v33, 0.0  ;;  %v2981_v15 = vld [vmem:[#allocation2 + $0x20] sm:$0xff]   ;;  %v2603_v33 = vld [vmem:[#allocation7 + $0xa8] sm:$0xf]  ;;  %p3326_p7 = scmp.ne.s32.totalorder %s3324_s26, %s3325_s20  ;;  %p3331_p9 = scmp.lt.s32.totalorder %s3329_s10, %s3325_s20 }
  0x7d   : > { %v516_v23 = vunpack.c.l.b16 %v460_v18  ;;  %v517_v24 = vunpack.c.l.b16 %v461_v19  ;;  %v3658_v40 = vpack.c.bf16 %v442_v36, %v442_v36  ;;  %v3660_v41 = vpack.c.bf16 %v443_v37, %v443_v37  ;;  %v2903_v37 = vld [vmem:[#allocation7 + $0x170] sm:$0xf0] }
  0x7e   : > { %606 = vmatpush.bf16.msra.mxu0 %v2854_v4  ;;  %2989 = vmatpush.bf16.msra.mxu3 %v2854_v4  ;;  %4474 = vst [vmem:[#allocation33_spill] sm:$0xff] %v3652_v20  ;;  %v530_v25 = vunpack.c.l.b16 %v3652_v20  ;;  %v531_v26 = vunpack.c.l.b16 %v3654_v21  ;;  %v3662_v42 = vpack.c.bf16 %v456_v38, %v456_v38  ;;  %v3664_v43 = vpack.c.bf16 %v457_v39, %v457_v39  ;;  %v2980_v4 = vld [vmem:[#allocation2 + $0x18] sm:$0xff]   ;;  %v2605_v39 = vld [vmem:[#allocation7 + $0xb4] sm:$0xf0]  ;;  %p3327_p2 = pnand %p3326_p7, %p3529_p3  ;;  %p3332_p10 = por %p3331_p9, %p3330_p6 }
  0x7f   : > { %4475 = vst [vmem:[#allocation34_spill] sm:$0xff] %v3654_v21  ;;  %v536_v34 = vpack.c.b16 %v517_v24, %v516_v23  ;;  %v518_v44 = vunpack.c.l.b16 %v3658_v40  ;;  %v519_v45 = vunpack.c.l.b16 %v3660_v41  ;;  %v2948_v52 = vunpack.c.l.bf16 %v2979_v48  ;;  %v2878_v38 = vld [vmem:[#allocation7 + $0xac] sm:$0xf] }
  0x80   : > { %v543_v35 = vpack.c.b16 %v531_v26, %v530_v25  ;;  %4476 = vst [vmem:[#allocation35_spill] sm:$0xff] %v3658_v40  ;;  %v532_v46 = vunpack.c.l.b16 %v3662_v42  ;;  %v533_v47 = vunpack.c.l.b16 %v3664_v43  ;;  %v2949_v53 = vunpack.c.h.bf16 %v2979_v48  ;;  %v2687_v48 = vld [vmem:[#allocation7 + $0x150] sm:$0xf]  ;;  %p3328_p5 = pneg %p3327_p2 }
  0x81   : > { %4477 = vst [vmem:[#allocation36_spill] sm:$0xff] %v3660_v41  ;;  %v537_v50 = vpack.c.b16 %v519_v45, %v518_v44  ;;  %v2976_v54 = vunpack.c.l.bf16 %v2986_v49  ;;  %v2977_v55 = vunpack.c.h.bf16 %v2986_v49  ;;  %v444_v56 = vmax.f32 %v2948_v52, 0.0  ;;  %v2875_v52 = vld [vmem:[#allocation7 + $0x94] sm:$0xf] }
  0x82   : > { %607 = vmatpush.bf16.msra.mxu0 %v2853_v5  ;;  %2990 = vmatpush.bf16.msra.mxu3 %v2853_v5  ;;  %4478 = vst [vmem:[#allocation37_spill] sm:$0xff] %v3662_v42  ;;  %v544_v51 = vpack.c.b16 %v533_v47, %v532_v46  ;;  %v445_v57 = vmax.f32 %v2949_v53, 0.0  ;;  %v2952_v7 = vunpack.c.l.bf16 %v2980_v4  ;;  %v2953_v8 = vunpack.c.h.bf16 %v2980_v4  ;;  %v2591_v46 = vld [vmem:[#allocation7 + $0x90] sm:$0xf]  ;;  %v2876_v47 = vld [vmem:[#allocation7 + $0x98] sm:$0xf0]  ;;  %p3333_p11 = pnand %p3332_p10, %p3328_p5 }
  0x83   : > { %4479 = vst [vmem:[#allocation38_spill] sm:$0xff] %v3664_v43  ;;  %v458_v58 = vmax.f32 %v2976_v54, 0.0  ;;  %v459_v59 = vmax.f32 %v2977_v55, 0.0  ;;  %v3670_v60 = vpack.c.bf16 %v444_v56, %v444_v56  ;;  %v2957_v18 = vunpack.c.h.bf16 %v2981_v15  ;;  %v2593_v53 = vld [vmem:[#allocation7 + $0x9c] sm:$0xf0] }
  0x84   : > { %v3672_v61 = vpack.c.bf16 %v445_v57, %v445_v57  ;;  %v446_v9 = vmax.f32 %v2952_v7, 0.0  ;;  %v447_v10 = vmax.f32 %v2953_v8, 0.0  ;;  %v2960_v28 = vunpack.c.l.bf16 %v2982_v27  ;;  %v2579_v7 = vld [vmem:[#allocation7 + $0x78] sm:$0xf]  ;;  %v2873_v8 = vld [vmem:[#allocation7 + $0x80] sm:$0xf0] }
  0x85   : > { %4480 = vst [vmem:[#allocation39_spill] sm:$0xff] %v3670_v60  ;;  %v478_v62 = vpack.c.bf16 %v458_v58, %v458_v58  ;;  %v479_v63 = vpack.c.bf16 %v459_v59, %v459_v59  ;;  %v520_v0 = vunpack.c.l.b16 %v3670_v60  ;;  %v2608_v45 = vor.u32 %v2878_v38, %v2605_v39  ;;  %v2983_v59 = vld [vmem:[#allocation2 + $0x30] sm:$0xff]   ;;  %v2557_v38 = vld [vmem:[#allocation7 + $0x54] sm:$0xf0] }
  0x86   : > { %608 = vmatpush.bf16.msra.mxu0 %v2852_v12  ;;  %2991 = vmatpush.bf16.msra.mxu3 %v2852_v12  ;;  %4481 = vst [vmem:[#allocation40_spill] sm:$0xff] %v3672_v61  ;;  %v521_v1 = vunpack.c.l.b16 %v3672_v61  ;;  %v3676_v11 = vpack.c.bf16 %v446_v9, %v446_v9  ;;  %v3678_v12 = vpack.c.bf16 %v447_v10, %v447_v10  ;;  %v450_v31 = vmax.f32 %v2960_v28, 0.0  ;;  %v2675_v9 = vld [vmem:[#allocation7 + $0x138] sm:$0xf]  ;;  %v2869_v28 = vld [vmem:[#allocation7 + $0x64] sm:$0xf] }
  0x87   : > { %v534_v2 = vunpack.c.l.b16 %v478_v62  ;;  %v535_v3 = vunpack.c.l.b16 %v479_v63  ;;  %v2596_v56 = vor.u32 %v2875_v52, %v2593_v53  ;;  %v2964_v63 = vunpack.c.l.bf16 %v2983_v59  ;;  %v2545_v52 = vld [vmem:[#allocation7 + $0x3c] sm:$0xf0]  ;;  %v2907_v61 = vld [vmem:[#allocation7 + $0x190] sm:$0xf0] }
  0x88   : > { %v538_v5 = vpack.c.b16 %v521_v1, %v520_v0  ;;  %4482 = vst [vmem:[#allocation41_spill] sm:$0xff] %v3676_v11  ;;  %v522_v13 = vunpack.c.l.b16 %v3676_v11  ;;  %v523_v14 = vunpack.c.l.b16 %v3678_v12  ;;  %v3688_v49 = vpack.c.bf16 %v450_v31, %v450_v31  ;;  %v2719_v11 = vld [vmem:[#allocation7 + $0x188] sm:$0xf] }
  0x89   : > { %v545_v6 = vpack.c.b16 %v535_v3, %v534_v2  ;;  %4483 = vst [vmem:[#allocation42_spill] sm:$0xff] %v3678_v12  ;;  %v2965_v0 = vunpack.c.h.bf16 %v2983_v59  ;;  %v452_v1 = vmax.f32 %v2964_v63, 0.0  ;;  %v2627_v59 = vld [vmem:[#allocation7 + $0xd8] sm:$0xf]  ;;  %v2720_v60 = vor.u32 %v2907_v61, %v2719_v11 }
  0x8a   : > { %609 = vmatpush.bf16.msra.mxu0 %v2851_v17  ;;  %2992 = vmatpush.bf16.msra.mxu3 %v2851_v17  ;;  %v539_v16 = vpack.c.b16 %v523_v14, %v522_v13  ;;  %v2956_v17 = vunpack.c.l.bf16 %v2981_v15  ;;  %4486 = vst [vmem:[#allocation45_spill] sm:$0xff] %v3688_v49  ;;  %v526_v57 = vunpack.c.l.b16 %v3688_v49  ;;  %v2580_v13 = vor.u32 %v2873_v8, %v2579_v7  ;;  %v2897_v14 = vld [vmem:[#allocation7 + $0x140] sm:$0xf0]  ;;  %v2872_v15 = vld [vmem:[#allocation7 + $0x7c] sm:$0xf] }
  0x8b   : > { %v453_v2 = vmax.f32 %v2965_v0, 0.0  ;;  %v3694_v3 = vpack.c.bf16 %v452_v1, %v452_v1  ;;  %v2860_v0 = vld [vmem:[#allocation7 + $0x1c] sm:$0xf]  ;;  %v2533_v1 = vld [vmem:[#allocation7 + $0x24] sm:$0xf0] }
  0x8c   : > { %v448_v19 = vmax.f32 %v2956_v17, 0.0  ;;  %v2581_v17 = vld [vmem:[#allocation7 + $0x84] sm:$0xf0]  ;;  %v2615_v7 = vld [vmem:[#allocation7 + $0xc0] sm:$0xf] }
  0x8d   : > { %4488 = vst [vmem:[#allocation47_spill] sm:$0xff] %v3694_v3  ;;  %v3696_v4 = vpack.c.bf16 %v453_v2, %v453_v2  ;;  %v2536_v2 = vor.u32 %v2860_v0, %v2533_v1  ;;  %v2924_v0 = vld [vmem:[#allocation7 + $0x218] sm:$0xf0]  ;;  %v2913_v49 = vld [vmem:[#allocation7 + $0x1c0] sm:$0xf0] }
  0x8e   : > { %610 = vmatpush.bf16.msra.mxu0 %v2850_v22  ;;  %2993 = vmatpush.bf16.msra.mxu3 %v2850_v22  ;;  %v449_v22 = vmax.f32 %v2957_v18, 0.0  ;;  %v3682_v23 = vpack.c.bf16 %v448_v19, %v448_v19  ;;  %v2584_v18 = vor.u32 %v2872_v15, %v2581_v17  ;;  %v2567_v19 = vld [vmem:[#allocation7 + $0x60] sm:$0xf] }
  0x8f   : > { %4489 = vst [vmem:[#allocation48_spill] sm:$0xff] %v3696_v4 }
  0x90   : > { %4484 = vst [vmem:[#allocation43_spill] sm:$0xff] %v3682_v23  ;;  %v3684_v24 = vpack.c.bf16 %v449_v22, %v449_v22  ;;  %v524_v25 = vunpack.c.l.b16 %v3682_v23  ;;  %v2870_v22 = vld [vmem:[#allocation7 + $0x68] sm:$0xf0] }
  0x92   : > { %611 = vmatpush.bf16.msra.mxu0 %v2849_v29  ;;  %2994 = vmatpush.bf16.msra.mxu3 %v2849_v29  ;;  %4485 = vst [vmem:[#allocation44_spill] sm:$0xff] %v3684_v24  ;;  %v525_v26 = vunpack.c.l.b16 %v3684_v24  ;;  %v2961_v29 = vunpack.c.h.bf16 %v2982_v27  ;;  %v2894_v27 = vld [vmem:[#allocation7 + $0x128] sm:$0xf0] }
  0x94   : > { %v540_v30 = vpack.c.b16 %v525_v26, %v524_v25  ;;  %v451_v32 = vmax.f32 %v2961_v29, 0.0  ;;  %v2663_v25 = vld [vmem:[#allocation7 + $0x120] sm:$0xf]  ;;  %v2568_v26 = vor.u32 %v2870_v22, %v2567_v19  ;;  %v2569_v29 = vld [vmem:[#allocation7 + $0x6c] sm:$0xf0] }
  0x95   : > { %612 = vmatmul.bf16.vlgmr.msra.gmra.mxu0 %v536_v34  ;;  %647 = vmatmul.bf16.vlgmr.msra.gmra.mxu3 %v543_v35  ;;  %v2879_v34 = vld [vmem:[#allocation7 + $0xb0] sm:$0xf0]  ;;  %v2699_v35 = vld [vmem:[#allocation7 + $0x168] sm:$0xf]  ;;  %v2572_v31 = vor.u32 %v2869_v28, %v2569_v29  ;;  %v2701_v19 = vld [vmem:[#allocation7 + $0x174] sm:$0xf0] }
  0x96   : > { %v2604_v36 = vor.u32 %v2879_v34, %v2603_v33  ;;  %v2700_v44 = vor.u32 %v2903_v37, %v2699_v35  ;;  %v3690_v54 = vpack.c.bf16 %v451_v32, %v451_v32  ;;  %1719 = vmatpush.bf16.msrb.mxu0 %v2608_v45  ;;  %v2555_v32 = vld [vmem:[#allocation7 + $0x48] sm:$0xf]  ;;  %v2867_v33 = vld [vmem:[#allocation7 + $0x50] sm:$0xf0]  ;;  %v2866_v37 = vld [vmem:[#allocation7 + $0x4c] sm:$0xf] }
  0x97   : > { %v2651_v34 = vld [vmem:[#allocation7 + $0x108] sm:$0xf]  ;;  %v2556_v35 = vor.u32 %v2867_v33, %v2555_v32  ;;  %v2543_v45 = vld [vmem:[#allocation7 + $0x30] sm:$0xf] }
  0x98   : > { %1554 = vmatpush.bf16.msra.mxu1 %v2604_v36  ;;  %2995 = vmatpush.bf16.msrb.mxu3 %v2604_v36  ;;  %4487 = vst [vmem:[#allocation46_spill] sm:$0xff] %v3690_v54  ;;  %v527_v58 = vunpack.c.l.b16 %v3690_v54  ;;  %v2891_v36 = vld [vmem:[#allocation7 + $0x110] sm:$0xf0] }
  0x99   : > { %1609 = vmatpush.bf16.msra.mxu2 %v2700_v44  ;;  %v2652_v39 = vor.u32 %v2891_v36, %v2651_v34  ;;  %v2560_v44 = vor.u32 %v2866_v37, %v2557_v38  ;;  %v2899_v37 = vld [vmem:[#allocation7 + $0x154] sm:$0xf]  ;;  %v2689_v38 = vld [vmem:[#allocation7 + $0x15c] sm:$0xf0] }
  0x9a   : > { %1720 = vmatpush.bf16.msrb.mxu0 %v2596_v56  ;;  %v541_v62 = vpack.c.b16 %v527_v58, %v526_v57  ;;  %v2531_v56 = vld [vmem:[#allocation7 + $0x18] sm:$0xf]  ;;  %v2861_v57 = vld [vmem:[#allocation7 + $0x20] sm:$0xf0] }
  0x9b   : > { %v2532_v58 = vor.u32 %v2861_v57, %v2531_v56 }
  0x9e   : > { %1721 = vmatpush.bf16.msrb.mxu0 %v2584_v18  ;;  %v2902_v18 = vld [vmem:[#allocation7 + $0x16c] sm:$0xf] }
  0x9f   : > { %v2704_v22 = vor.u32 %v2902_v18, %v2701_v19 }
  0xa2   : > { %1722 = vmatpush.bf16.msrb.mxu0 %v2572_v31 }
  0xa5   : > { %617 = vmatmul.bf16.gmra.mxu0 %v537_v50  ;;  %652 = vmatmul.bf16.gmra.mxu3 %v544_v51  ;;  %v2592_v50 = vor.u32 %v2876_v47, %v2591_v46  ;;  %v2900_v51 = vld [vmem:[#allocation7 + $0x158] sm:$0xf0]  ;;  %v2639_v47 = vld [vmem:[#allocation7 + $0xf0] sm:$0xf] }
  0xa6   : > { %v2688_v55 = vor.u32 %v2900_v51, %v2687_v48  ;;  %v2864_v46 = vld [vmem:[#allocation7 + $0x38] sm:$0xf0]  ;;  %v2863_v51 = vld [vmem:[#allocation7 + $0x34] sm:$0xf]  ;;  %1723 = vmatpush.bf16.msrb.mxu0 %v2560_v44  ;;  %v2692_v44 = vor.u32 %v2899_v37, %v2689_v38 }
  0xa7   : > { %1555 = vmatpush.bf16.msra.mxu1 %v2592_v50  ;;  %2996 = vmatpush.bf16.msrb.mxu3 %v2592_v50  ;;  %v2544_v48 = vor.u32 %v2864_v46, %v2543_v45  ;;  %v2888_v50 = vld [vmem:[#allocation7 + $0xf8] sm:$0xf0]  ;;  %v2795_v45 = vld [vmem:[#allocation7 + $0x228] sm:$0xf]  ;;  %v2927_v46 = vld [vmem:[#allocation7 + $0x230] sm:$0xf0] }
  0xa8   : > { %1610 = vmatpush.bf16.msra.mxu2 %v2688_v55  ;;  %v2640_v53 = vor.u32 %v2888_v50, %v2639_v47  ;;  %v2548_v55 = vor.u32 %v2863_v51, %v2545_v52  ;;  %v2796_v51 = vor.u32 %v2927_v46, %v2795_v45  ;;  %v2759_v46 = vld [vmem:[#allocation7 + $0x1e0] sm:$0xf] }
  0xaa   : > { %1724 = vmatpush.bf16.msrb.mxu0 %v2548_v55 }
  0xab   : > { %1556 = vmatpush.bf16.msra.mxu1 %v2580_v13  ;;  %2997 = vmatpush.bf16.msrb.mxu3 %v2580_v13  ;;  %v2521_v13 = vld [vmem:[#allocation7 + $0xc] sm:$0xf0] }
  0xae   : > { %1725 = vmatpush.bf16.msrb.mxu0 %v2536_v2 }
  0xaf   : > { %1557 = vmatpush.bf16.msra.mxu1 %v2568_v26  ;;  %2998 = vmatpush.bf16.msrb.mxu3 %v2568_v26  ;;  %v708_v26 = vstv %s707_s22 }
  0xb0   : > { %vm709_vm0 = vcmp.eq.s32.totalorder %v708_v26, 1 }
  0xb3   : > { %1558 = vmatpush.bf16.msra.mxu1 %v2556_v35  ;;  %2999 = vmatpush.bf16.msrb.mxu3 %v2556_v35 }
  0xb5   : > { %622 = vmatmul.bf16.gmra.mxu0 %v538_v5  ;;  %657 = vmatmul.bf16.gmra.mxu3 %v545_v6  ;;  %v528_v5 = vunpack.c.l.b16 %v3694_v3  ;;  %v529_v6 = vunpack.c.l.b16 %v3696_v4 }
  0xb7   : > { %v542_v10 = vpack.c.b16 %v529_v6, %v528_v5  ;;  %1559 = vmatpush.bf16.msra.mxu1 %v2544_v48  ;;  %3000 = vmatpush.bf16.msrb.mxu3 %v2544_v48  ;;  %v2519_v5 = vld [vmem:[#allocation7] sm:$0xf]  ;;  %v2858_v6 = vld [vmem:[#allocation7 + $0x8] sm:$0xf0] }
  0xb8   : > { %v2520_v8 = vor.u32 %v2858_v6, %v2519_v5 }
  0xbb   : > { %1560 = vmatpush.bf16.msra.mxu1 %v2532_v58  ;;  %3001 = vmatpush.bf16.msrb.mxu3 %v2532_v58 }
  0xbf   : > { %1561 = vmatpush.bf16.msra.mxu1 %v2520_v8  ;;  %3002 = vmatpush.bf16.msrb.mxu3 %v2520_v8 }
  0xc3   : > { %1774 = vmatpush.bf16.msrb.mxu1 %v2704_v22  ;;  %1664 = vmatpush.bf16.msra.mxu3 %v2796_v51 }
  0xc5   : > { %627 = vmatmul.bf16.gmra.mxu0 %v539_v16  ;;  %v2676_v16 = vor.u32 %v2897_v14, %v2675_v9  ;;  %v2882_v9 = vld [vmem:[#allocation7 + $0xc8] sm:$0xf0] }
  0xc6   : > { %v2616_v14 = vor.u32 %v2882_v9, %v2615_v7 }
  0xc7   : > { %1611 = vmatpush.bf16.msra.mxu2 %v2676_v16  ;;  %v3703_v16 = vld [vmem:[%s4430_s2] ss:$0 sm:$0xff]  ;;  %1775 = vmatpush.bf16.msrb.mxu1 %v2692_v44 }
  0xd5   : > { %632 = vmatmul.bf16.gmra.mxu0 %v540_v30  ;;  %v2664_v30 = vor.u32 %v2894_v27, %v2663_v25  ;;  %v737_v27 = vlaneseq }
  0xd7   : > { %1612 = vmatpush.bf16.msra.mxu2 %v2664_v30  ;;  %v3710_v33 = vshrl.u32 %v737_v27, 7 }
  0xd9   : > { %vm762_vm1 = vcmp.lt.s32.totalorder %v3710_v33, 1  ;;  %vm740_vm2 = vcmp.ge.s32.totalorder %v3710_v33, 1  ;;  %vm829_vm3 = vcmp.lt.s32.totalorder %v3710_v33, 7 }
  0xdb   : > { %1613 = vmatpush.bf16.msra.mxu2 %v2652_v39 }
  0xdf   : > { %1614 = vmatpush.bf16.msra.mxu2 %v2640_v53 }
  0xe5   : > { %637 = vmatmul.bf16.gmra.mxu0 %v541_v62  ;;  %v2885_v62 = vld [vmem:[#allocation7 + $0xe0] sm:$0xf0] }
  0xe6   : > { %v2628_v63 = vor.u32 %v2885_v62, %v2627_v59 }
  0xe8   : > { %1615 = vmatpush.bf16.msra.mxu2 %v2628_v63  ;;  %v2783_v63 = vld [vmem:[#allocation7 + $0x210] sm:$0xf] }
  0xe9   : > { %v2784_v2 = vor.u32 %v2924_v0, %v2783_v63 }
  0xeb   : > { %1665 = vmatpush.bf16.msra.mxu3 %v2784_v2 }
  0xec   : > { %1616 = vmatpush.bf16.msra.mxu2 %v2616_v14 }
  0xf5   : > { %642 = vmatmul.bf16.gmra.mxu0 %v542_v10  ;;  %v2857_v10 = vld [vmem:[#allocation7 + $0x4] sm:$0xf] }
  0xf6   : > { %v2524_v15 = vor.u32 %v2857_v10, %v2521_v13 }
  0xf8   : > { %1726 = vmatpush.bf16.msrb.mxu0 %v2524_v15  ;;  %v2771_v15 = vld [vmem:[#allocation7 + $0x1f8] sm:$0xf] }
 0x112   : > { %v613_v17 = vpop.f32.mrf.mxu0 }
 0x113   : > { %v667_v25 = vadd.f32 %v3703_v16, %v613_v17  ;;  %v2921_v17 = vld [vmem:[#allocation7 + $0x200] sm:$0xf0] }
 0x115   : > { %v687_v29 = vmax.f32 %v667_v25, 0.0 }
 0x117   : > { %v3712_v34 = vsel %vm709_vm0, 0.0, %v687_v29  ;;  %v2677_v29 = vld [vmem:[#allocation7 + $0x144] sm:$0xf0] }
 0x118   : > { %v648_v28 = vpop.f32.mrf.mxu3  ;;  %v742_v47 = vrot.slane %v3712_v34, 7 }
 0x119   : > { %v681_v30 = vadd.f32 %v3703_v16, %v648_v28  ;;  %v2896_v28 = vld [vmem:[#allocation7 + $0x13c] sm:$0xf] }
 0x11a   : > { %v615_v31 = vpop.f32.mrf.mxu0  ;;  %v2680_v37 = vor.u32 %v2896_v28, %v2677_v29 }
 0x11b   : > { %v668_v32 = vadd.f32 %v3703_v16, %v615_v31  ;;  %v3714_v36 = vmax.f32 %v681_v30, 0.0  ;;  %v2772_v30 = vor.u32 %v2921_v17, %v2771_v15 }
 0x11c   : > { %1776 = vmatpush.bf16.msrb.mxu1 %v2680_v37 }
 0x11d   : > { %v688_v35 = vmax.f32 %v668_v32, 0.0  ;;  %v749_v53 = vrot.slane %v3714_v36, 7  ;;  %1666 = vmatpush.bf16.msra.mxu3 %v2772_v30  ;;  %v816_v28 = vrot.slane %v3714_v36, 1 }
 0x11f   : > { %v3716_v39 = vsel %vm709_vm0, 0.0, %v688_v35 }
 0x120   : > { %v752_v48 = vrot.slane %v3716_v39, 7  ;;  %v650_v50 = vpop.f32.mrf.mxu3 }
 0x121   : > { %v682_v52 = vadd.f32 %v3703_v16, %v650_v50 }
 0x122   : > { %v763_v55 = vsel %vm762_vm1, %v742_v47, %v752_v48  ;;  %v618_v56 = vpop.f32.mrf.mxu0  ;;  %v773_v57 = vsel %vm762_vm1, %v752_v48, %v742_v47  ;;  %v2918_v47 = vld [vmem:[#allocation7 + $0x1e8] sm:$0xf0] }
 0x123   : > { %v876_v58 = vpack.c.bf16 %v3716_v39, %v763_v55  ;;  %v3729_v59 = vmax.f32 %v682_v52, 0.0  ;;  %v787_v62 = vsel %vm740_vm2, %v773_v57, 0.0  ;;  %v669_v7 = vadd.f32 %v3703_v16, %v618_v56  ;;  %v2747_v56 = vld [vmem:[#allocation7 + $0x1c8] sm:$0xf]  ;;  %v2915_v57 = vld [vmem:[#allocation7 + $0x1d0] sm:$0xf0] }
 0x124   : > { %v874_v1 = vpack.c.bf16 %v3712_v34, %v787_v62  ;;  %v2760_v48 = vor.u32 %v2918_v47, %v2759_v46  ;;  %v2748_v62 = vor.u32 %v2915_v57, %v2747_v56  ;;  %v2909_v56 = vld [vmem:[#allocation7 + $0x1a0] sm:$0xf0] }
 0x125   : > { %v759_v5 = vrot.slane %v3729_v59, 7  ;;  %v1053_v6 = vunpack.c.l.b16 %v876_v58  ;;  %v1054_v10 = vunpack.c.h.b16 %v876_v58  ;;  %v3752_v31 = vmax.f32 %v669_v7, 0.0 }
 0x126   : > { %v1050_v8 = vunpack.c.l.b16 %v874_v1  ;;  %v1051_v9 = vunpack.c.h.b16 %v874_v1  ;;  %1667 = vmatpush.bf16.msra.mxu3 %v2760_v48  ;;  %v826_v29 = vrot.slane %v3729_v59, 1 }
 0x127   : > { %v770_v13 = vsel %vm762_vm1, %v749_v53, %v759_v5  ;;  %v780_v14 = vsel %vm762_vm1, %v759_v5, %v749_v53  ;;  %v743_v52 = vrot.slane %v3752_v31, 7 }
 0x128   : > { %v3741_v18 = vpack.c.bf16 %v3729_v59, %v770_v13  ;;  %v653_v19 = vpop.f32.mrf.mxu3  ;;  %v3743_v22 = vpack.c.b16 %v1053_v6, %v1050_v8  ;;  %v3745_v25 = vpack.c.b16 %v1054_v10, %v1051_v9  ;;  %v801_v26 = vsel %vm740_vm2, %v780_v14, 0.0  ;;  %v2735_v10 = vld [vmem:[#allocation7 + $0x1b0] sm:$0xf]  ;;  %v2912_v13 = vld [vmem:[#allocation7 + $0x1b8] sm:$0xf0] }
 0x129   : > { %v3750_v27 = vpack.c.bf16 %v3714_v36, %v801_v26  ;;  %v683_v38 = vadd.f32 %v3703_v16, %v653_v19  ;;  %v2736_v17 = vor.u32 %v2912_v13, %v2735_v10  ;;  %v2906_v10 = vld [vmem:[#allocation7 + $0x188] sm:$0xf0]  ;;  %v847_v13 = vsel %vm829_vm3, %v826_v29, %v816_v28 }
 0x12a   : > { %v620_v32 = vpop.f32.mrf.mxu0  ;;  %1562 = vmatmul.bf16.vlgmr.msra.gmra.mxu1 %v3743_v22  ;;  %1617 = vmatmul.bf16.vlgmr.msra.gmra.mxu2 %v3745_v25  ;;  %v1095_v35 = vunpack.c.l.b16 %v3741_v18 }
 0x12b   : > { %v670_v44 = vadd.f32 %v3703_v16, %v620_v32  ;;  %1727 = vmatmul.bf16.vlgmr.msrb.gmra.mxu0 %v3743_v22  ;;  %v1092_v45 = vunpack.c.l.b16 %v3750_v27  ;;  %v3766_v53 = vmax.f32 %v683_v38, 0.0  ;;  %1668 = vmatpush.bf16.msra.mxu3 %v2748_v62  ;;  %v3791_v32 = vadd.s32 8, %v3710_v33 }
 0x12c   : > { %v1093_v46 = vunpack.c.h.b16 %v3750_v27 }
 0x12d   : > { %v3761_v50 = vmax.f32 %v670_v44, 0.0  ;;  %v3763_v51 = vpack.c.b16 %v1095_v35, %v1092_v45  ;;  %v750_v7 = vrot.slane %v3766_v53, 7  ;;  %v2893_v44 = vld [vmem:[#allocation7 + $0x124] sm:$0xf]  ;;  %v2665_v45 = vld [vmem:[#allocation7 + $0x12c] sm:$0xf0] }
 0x12e   : > { %vm808_vm5 = vcmp.lt.s32.totalorder %v3791_v32, 15 }
 0x12f   : > { %v753_v55 = vrot.slane %v3761_v50, 7  ;;  %1597 = vmatmul.bf16.vlgmr.msrb.gmra.mxu3 %v3763_v51 }
 0x130   : > { %v655_v58 = vpop.f32.mrf.mxu3  ;;  %1669 = vmatpush.bf16.msra.mxu3 %v2736_v17 }
 0x131   : > { %v764_v63 = vsel %vm762_vm1, %v743_v52, %v753_v55  ;;  %v684_v0 = vadd.f32 %v3703_v16, %v655_v58  ;;  %v774_v1 = vsel %vm762_vm1, %v753_v55, %v743_v52  ;;  %v2668_v52 = vor.u32 %v2893_v44, %v2665_v45  ;;  %v2723_v55 = vld [vmem:[#allocation7 + $0x198] sm:$0xf] }
 0x132   : > { %v880_v2 = vpack.c.bf16 %v3761_v50, %v764_v63  ;;  %v623_v5 = vpop.f32.mrf.mxu0  ;;  %v789_v6 = vsel %vm740_vm2, %v774_v1, 0.0  ;;  %v711_v58 = vstv %s3786_s13  ;;  %v2724_v27 = vor.u32 %v2909_v56, %v2723_v55 }
 0x133   : > { %v3779_v8 = vmax.f32 %v684_v0, 0.0  ;;  %v878_v9 = vpack.c.bf16 %v3752_v31, %v789_v6  ;;  %v671_v37 = vadd.f32 %v3703_v16, %v623_v5  ;;  %v837_v5 = vsel %vm829_vm3, %v816_v28, %v826_v29  ;;  %1777 = vmatpush.bf16.msrb.mxu1 %v2668_v52 }
 0x134   : > { %v1059_v14 = vunpack.c.l.b16 %v880_v2  ;;  %v1060_v15 = vunpack.c.h.b16 %v880_v2  ;;  %v1096_v2 = vunpack.c.h.b16 %v3741_v18  ;;  %1670 = vmatpush.bf16.msra.mxu3 %v2724_v27  ;;  %vm3828_vm4 = vcmp.eq.s32.totalorder %v711_v58, 1 }
 0x135   : > { %v760_v19 = vrot.slane %v3779_v8, 7  ;;  %v1056_v26 = vunpack.c.l.b16 %v878_v9  ;;  %v1057_v30 = vunpack.c.h.b16 %v878_v9  ;;  %v3819_v6 = vmax.f32 %v671_v37, 0.0  ;;  %v2711_v9 = vld [vmem:[#allocation7 + $0x180] sm:$0xf] }
 0x136   : > { %v3826_v18 = vpack.c.b16 %v1096_v2, %v1093_v46  ;;  %v869_v28 = vsel %vm808_vm5, %v847_v13, 0.0  ;;  %v903_v45 = vpack.c.bf16 %v837_v5, %v837_v5  ;;  %v817_v13 = vrot.slane %v3766_v53, 1 }
 0x137   : > { %v771_v35 = vsel %vm762_vm1, %v750_v7, %v760_v19  ;;  %v3796_v38 = vpack.c.b16 %v1059_v14, %v1056_v26  ;;  %v3802_v47 = vpack.c.b16 %v1060_v15, %v1057_v30  ;;  %v781_v48 = vsel %vm762_vm1, %v760_v19, %v750_v7 }
 0x138   : > { %v3800_v36 = vpack.c.bf16 %v3779_v8, %v771_v35  ;;  %v658_v59 = vpop.f32.mrf.mxu3  ;;  %v803_v62 = vsel %vm740_vm2, %v781_v48, 0.0  ;;  %v2712_v26 = vor.u32 %v2906_v10, %v2711_v9  ;;  %v744_v29 = vrot.slane %v3819_v6, 7 }
 0x139   : > { %v685_v57 = vadd.f32 %v3703_v16, %v658_v59  ;;  %v3813_v0 = vpack.c.bf16 %v3766_v53, %v803_v62  ;;  %v905_v52 = vpack.c.bf16 %v869_v28, %v869_v28  ;;  %v1094_v2 = vunpack.c.l.b16 %v903_v45 }
 0x13a   : > { %v625_v63 = vpop.f32.mrf.mxu0  ;;  %1567 = vmatmul.bf16.gmra.mxu1 %v3796_v38  ;;  %1622 = vmatmul.bf16.gmra.mxu2 %v3802_v47  ;;  %v1101_v1 = vunpack.c.l.b16 %v3800_v36  ;;  %v819_v45 = vrot.slane %v3716_v39, 1 }
 0x13b   : > { %v672_v7 = vadd.f32 %v3703_v16, %v625_v63  ;;  %1730 = vmatmul.bf16.gmra.mxu0 %v3796_v38  ;;  %v705_v14 = vmax.f32 %v685_v57, 0.0  ;;  %v1098_v15 = vunpack.c.l.b16 %v3813_v0  ;;  %1671 = vmatpush.bf16.msra.mxu3 %v2712_v26  ;;  %v1097_v10 = vunpack.c.l.b16 %v905_v52 }
 0x13c   : > { %v1099_v17 = vunpack.c.h.b16 %v3813_v0  ;;  %v1102_v52 = vunpack.c.h.b16 %v3800_v36 }
 0x13d   : > { %v3832_v19 = vmax.f32 %v672_v7, 0.0  ;;  %v3835_v30 = vpack.c.b16 %v1101_v1, %v1098_v15  ;;  %v3843_v37 = vsel %vm3828_vm4, 0.0, %v705_v14  ;;  %v827_v14 = vrot.slane %v3779_v8, 1 }
 0x13e   : > { %v751_v27 = vrot.slane %v3843_v37, 7 }
 0x13f   : > { %v754_v35 = vrot.slane %v3832_v19, 7  ;;  %1602 = vmatmul.bf16.gmra.mxu3 %v3835_v30 }
 0x140   : > { %v660_v44 = vpop.f32.mrf.mxu3 }
 0x141   : > { %v765_v46 = vsel %vm762_vm1, %v744_v29, %v754_v35  ;;  %v686_v59 = vadd.f32 %v3703_v16, %v660_v44  ;;  %v775_v48 = vsel %vm762_vm1, %v754_v35, %v744_v29  ;;  %v2890_v35 = vld [vmem:[#allocation7 + $0x10c] sm:$0xf]  ;;  %v2653_v44 = vld [vmem:[#allocation7 + $0x114] sm:$0xf0] }
 0x142   : > { %v884_v55 = vpack.c.bf16 %v3832_v19, %v765_v46  ;;  %v628_v56 = vpop.f32.mrf.mxu0  ;;  %v791_v57 = vsel %vm740_vm2, %v775_v48, 0.0  ;;  %v2656_v8 = vor.u32 %v2890_v35, %v2653_v44 }
 0x143   : > { %v706_v58 = vmax.f32 %v686_v59, 0.0  ;;  %v882_v62 = vpack.c.bf16 %v3819_v6, %v791_v57  ;;  %v673_v26 = vadd.f32 %v3703_v16, %v628_v56  ;;  %v838_v57 = vsel %vm829_vm3, %v817_v13, %v827_v14 }
 0x144   : > { %v1065_v63 = vunpack.c.l.b16 %v884_v55  ;;  %v1066_v1 = vunpack.c.h.b16 %v884_v55  ;;  %v3878_v55 = vpack.c.b16 %v1097_v10, %v1094_v2  ;;  %1778 = vmatpush.bf16.msrb.mxu1 %v2656_v8 }
 0x145   : > { %v3858_v5 = vsel %vm3828_vm4, 0.0, %v706_v58  ;;  %v1062_v7 = vunpack.c.l.b16 %v882_v62  ;;  %v1063_v9 = vunpack.c.h.b16 %v882_v62  ;;  %v3880_v56 = vmax.f32 %v673_v26, 0.0 }
 0x146   : > { %v761_v15 = vrot.slane %v3858_v5, 7  ;;  %v848_v58 = vsel %vm829_vm3, %v827_v14, %v817_v13 }
 0x147   : > { %v3864_v28 = vpack.c.b16 %v1065_v63, %v1062_v7  ;;  %v3866_v29 = vpack.c.b16 %v1066_v1, %v1063_v9  ;;  %v871_v63 = vsel %vm808_vm5, %v848_v58, 0.0  ;;  %v809_v1 = vrot.slane %v3712_v34, 1  ;;  %v2887_v58 = vld [vmem:[#allocation7 + $0xf4] sm:$0xf] }
 0x148   : > { %v772_v46 = vsel %vm762_vm1, %v751_v27, %v761_v15  ;;  %v782_v53 = vsel %vm762_vm1, %v761_v15, %v751_v27  ;;  %v3891_v27 = vpack.c.b16 %v1102_v52, %v1099_v17  ;;  %v907_v7 = vpack.c.bf16 %v838_v57, %v838_v57 }
 0x149   : > { %v912_v59 = vpack.c.bf16 %v3858_v5, %v772_v46  ;;  %v805_v48 = vsel %vm740_vm2, %v782_v53, 0.0  ;;  %v909_v9 = vpack.c.bf16 %v871_v63, %v871_v63  ;;  %v840_v13 = vsel %vm829_vm3, %v819_v45, %v809_v1 }
 0x14a   : > { %v630_v0 = vpop.f32.mrf.mxu0  ;;  %1572 = vmatmul.bf16.gmra.mxu1 %v3864_v28  ;;  %1627 = vmatmul.bf16.gmra.mxu2 %v3866_v29  ;;  %v910_v39 = vpack.c.bf16 %v3843_v37, %v805_v48  ;;  %v1100_v15 = vunpack.c.l.b16 %v907_v7  ;;  %v745_v35 = vrot.slane %v3880_v56, 7  ;;  %v818_v34 = vrot.slane %v3843_v37, 1 }
 0x14b   : > { %v674_v62 = vadd.f32 %v3703_v16, %v630_v0  ;;  %1735 = vmatmul.bf16.gmra.mxu0 %v3864_v28  ;;  %v1107_v36 = vunpack.c.l.b16 %v912_v59  ;;  %v1103_v26 = vunpack.c.l.b16 %v909_v9  ;;  %v855_v8 = vsel %vm808_vm5, %v840_v13, 0.0 }
 0x14c   : > { %v1104_v2 = vunpack.c.l.b16 %v910_v39  ;;  %v828_v48 = vrot.slane %v3858_v5, 1  ;;  %v830_v37 = vsel %vm829_vm3, %v809_v1, %v819_v45  ;;  %v877_v5 = vpack.c.bf16 %v855_v8, %v855_v8 }
 0x14d   : > { %v3896_v10 = vmax.f32 %v674_v62, 0.0  ;;  %v3905_v17 = vpack.c.b16 %v1103_v26, %v1100_v15  ;;  %v2641_v62 = vld [vmem:[#allocation7 + $0xfc] sm:$0xf0]  ;;  %v875_v15 = vpack.c.bf16 %v830_v37, %v830_v37  ;;  %v1105_v26 = vunpack.c.h.b16 %v910_v39 }
 0x14e   : > { %v3900_v14 = vpack.c.b16 %v1107_v36, %v1104_v2  ;;  %v2644_v63 = vor.u32 %v2887_v58, %v2641_v62  ;;  %v849_v45 = vsel %vm829_vm3, %v828_v48, %v818_v34 }
 0x14f   : > { %v755_v44 = vrot.slane %v3896_v10, 7  ;;  %v873_v8 = vsel %vm808_vm5, %v849_v45, 0.0  ;;  %v1052_v37 = vunpack.c.l.b16 %v875_v15  ;;  %v2884_v45 = vld [vmem:[#allocation7 + $0xdc] sm:$0xf] }
 0x150   : > { %1605 = vmatmul.bf16.gmra.mxu3 %v3900_v14  ;;  %1779 = vmatpush.bf16.msrb.mxu1 %v2644_v63  ;;  %v913_v39 = vpack.c.bf16 %v873_v8, %v873_v8 }
 0x151   : > { %v766_v46 = vsel %vm762_vm1, %v745_v35, %v755_v44  ;;  %v776_v53 = vsel %vm762_vm1, %v755_v44, %v745_v35  ;;  %v1108_v35 = vunpack.c.h.b16 %v912_v59  ;;  %v839_v44 = vsel %vm829_vm3, %v818_v34, %v828_v48 }
 0x152   : > { %v888_v52 = vpack.c.bf16 %v3896_v10, %v766_v46  ;;  %v633_v0 = vpop.f32.mrf.mxu0  ;;  %v793_v57 = vsel %vm740_vm2, %v776_v53, 0.0  ;;  %v1055_v34 = vunpack.c.l.b16 %v877_v5  ;;  %v1109_v62 = vunpack.c.l.b16 %v913_v39 }
 0x153   : > { %v886_v36 = vpack.c.bf16 %v3880_v56, %v793_v57  ;;  %v675_v1 = vadd.f32 %v3703_v16, %v633_v0  ;;  %v911_v57 = vpack.c.bf16 %v839_v44, %v839_v44 }
 0x154   : > { %v1071_v2 = vunpack.c.l.b16 %v888_v52  ;;  %v1072_v7 = vunpack.c.h.b16 %v888_v52  ;;  %v3930_v52 = vpack.c.b16 %v1108_v35, %v1105_v26 }
 0x155   : > { %v1068_v9 = vunpack.c.l.b16 %v886_v36  ;;  %v1069_v13 = vunpack.c.h.b16 %v886_v36  ;;  %v1106_v48 = vunpack.c.l.b16 %v911_v57  ;;  %v3936_v0 = vmax.f32 %v675_v1, 0.0  ;;  %v2629_v1 = vld [vmem:[#allocation7 + $0xe4] sm:$0xf0] }
 0x156   : > { %v820_v36 = vrot.slane %v3761_v50, 1 }
 0x157   : > { %v3926_v46 = vpack.c.b16 %v1071_v2, %v1068_v9  ;;  %v3928_v53 = vpack.c.b16 %v1072_v7, %v1069_v13  ;;  %v3943_v2 = vpack.c.b16 %v1109_v62, %v1106_v48  ;;  %v810_v7 = vrot.slane %v3752_v31, 1 }
 0x158   : > { %v3946_v9 = vpack.c.b16 %v1055_v34, %v1052_v37  ;;  %v746_v13 = vrot.slane %v3936_v0, 7 }
 0x159   : > { %v841_v5 = vsel %vm829_vm3, %v820_v36, %v810_v7  ;;  %v831_v57 = vsel %vm829_vm3, %v810_v7, %v820_v36 }
 0x15a   : > { %v635_v59 = vpop.f32.mrf.mxu0  ;;  %1577 = vmatmul.bf16.gmra.mxu1 %v3926_v46  ;;  %1632 = vmatmul.bf16.gmra.mxu2 %v3928_v53  ;;  %v857_v39 = vsel %vm808_vm5, %v841_v5, 0.0  ;;  %v879_v62 = vpack.c.bf16 %v831_v57, %v831_v57 }
 0x15b   : > { %v676_v58 = vadd.f32 %v3703_v16, %v635_v59  ;;  %1740 = vmatmul.bf16.gmra.mxu0 %v3926_v46  ;;  %v2632_v59 = vor.u32 %v2884_v45, %v2629_v1  ;;  %v2881_v45 = vld [vmem:[#allocation7 + $0xc4] sm:$0xf]  ;;  %v2617_v1 = vld [vmem:[#allocation7 + $0xcc] sm:$0xf0] }
 0x15c   : > { %v1058_v36 = vunpack.c.l.b16 %v879_v62  ;;  %v2880_v62 = vld [vmem:[#allocation7 + $0xb8] sm:$0xf0] }
 0x15d   : > { %v3941_v63 = vmax.f32 %v676_v58, 0.0  ;;  %1780 = vmatpush.bf16.msrb.mxu1 %v2632_v59 }
 0x15f   : > { %v756_v15 = vrot.slane %v3941_v63, 7 }
 0x160   : > { %1672 = vmatmul.bf16.vlgmr.msra.gmra.mxu3 %v3946_v9 }
 0x161   : > { %v767_v50 = vsel %vm762_vm1, %v746_v13, %v756_v15  ;;  %v777_v26 = vsel %vm762_vm1, %v756_v15, %v746_v13  ;;  %v881_v13 = vpack.c.bf16 %v857_v39, %v857_v39  ;;  %v811_v39 = vrot.slane %v3819_v6, 1 }
 0x162   : > { %v892_v35 = vpack.c.bf16 %v3941_v63, %v767_v50  ;;  %v638_v31 = vpop.f32.mrf.mxu0  ;;  %v795_v44 = vsel %vm740_vm2, %v777_v26, 0.0 }
 0x163   : > { %v890_v8 = vpack.c.bf16 %v3936_v0, %v795_v44  ;;  %v677_v15 = vadd.f32 %v3703_v16, %v638_v31  ;;  %v1061_v7 = vunpack.c.l.b16 %v881_v13  ;;  %v821_v31 = vrot.slane %v3832_v19, 1  ;;  %v2707_v19 = vld [vmem:[#allocation7 + $0x170] sm:$0xf] }
 0x164   : > { %v1077_v37 = vunpack.c.l.b16 %v892_v35  ;;  %v1078_v34 = vunpack.c.h.b16 %v892_v35 }
 0x165   : > { %v1074_v48 = vunpack.c.l.b16 %v890_v8  ;;  %v1075_v58 = vunpack.c.h.b16 %v890_v8  ;;  %v3972_v5 = vmax.f32 %v677_v15, 0.0  ;;  %v2620_v8 = vor.u32 %v2881_v45, %v2617_v1 }
 0x166   : > { %v3980_v59 = vpack.c.b16 %v1061_v7, %v1058_v36 }
 0x167   : > { %v3966_v50 = vpack.c.b16 %v1077_v37, %v1074_v48  ;;  %v3968_v26 = vpack.c.b16 %v1078_v34, %v1075_v58  ;;  %1781 = vmatpush.bf16.msrb.mxu1 %v2620_v8  ;;  %v747_v37 = vrot.slane %v3972_v5, 7  ;;  %v842_v48 = vsel %vm829_vm3, %v821_v31, %v811_v39  ;;  %v2611_v58 = vld [vmem:[#allocation7 + $0xb0] sm:$0xf] }
 0x168   : > { %v2612_v15 = vor.u32 %v2880_v62, %v2611_v58  ;;  %v832_v8 = vsel %vm829_vm3, %v811_v39, %v821_v31  ;;  %v859_v43 = vsel %vm808_vm5, %v842_v48, 0.0 }
 0x169   : > { %v883_v62 = vpack.c.bf16 %v832_v8, %v832_v8 }
 0x16a   : > { %v640_v44 = vpop.f32.mrf.mxu0  ;;  %1582 = vmatmul.bf16.gmra.mxu1 %v3966_v50  ;;  %1637 = vmatmul.bf16.gmra.mxu2 %v3968_v26 }
 0x16b   : > { %v678_v35 = vadd.f32 %v3703_v16, %v640_v44  ;;  %1745 = vmatmul.bf16.gmra.mxu0 %v3966_v50  ;;  %v2904_v44 = vld [vmem:[#allocation7 + $0x178] sm:$0xf0]  ;;  %1884 = vmatpush.bf16.msrb.mxu3 %v2612_v15  ;;  %v1064_v31 = vunpack.c.l.b16 %v883_v62 }
 0x16c   : > { %v2708_v45 = vor.u32 %v2904_v44, %v2707_v19 }
 0x16d   : > { %v3977_v57 = vmax.f32 %v678_v35, 0.0 }
 0x16e   : > { %1939 = vmatpush.bf16.msra.mxu0 %v2708_v45  ;;  %v812_v45 = vrot.slane %v3880_v56, 1 }
 0x16f   : > { %v757_v34 = vrot.slane %v3977_v57, 7  ;;  %v824_v4 = vrot.slane %v3977_v57, 1 }
 0x170   : > { %1677 = vmatmul.bf16.gmra.mxu3 %v3980_v59 }
 0x171   : > { %v768_v13 = vsel %vm762_vm1, %v747_v37, %v757_v34  ;;  %v778_v6 = vsel %vm762_vm1, %v757_v34, %v747_v37 }
 0x172   : > { %v896_v36 = vpack.c.bf16 %v3977_v57, %v768_v13  ;;  %v643_v7 = vpop.f32.mrf.mxu0  ;;  %v797_v35 = vsel %vm740_vm2, %v778_v6, 0.0  ;;  %v885_v13 = vpack.c.bf16 %v859_v43, %v859_v43  ;;  %v2803_v43 = vld [vmem:[#allocation7 + $0x230] sm:$0xf]  ;;  %v814_v57 = vrot.slane %v3972_v5, 1 }
 0x173   : > { %v894_v1 = vpack.c.bf16 %v3972_v5, %v797_v35  ;;  %v679_v21 = vadd.f32 %v3703_v16, %v643_v7 }
 0x174   : > { %v1083_v42 = vunpack.c.l.b16 %v896_v36  ;;  %v1084_v37 = vunpack.c.h.b16 %v896_v36  ;;  %v1067_v39 = vunpack.c.l.b16 %v885_v13  ;;  %v2928_v36 = vld [vmem:[#allocation7 + $0x238] sm:$0xf0]  ;;  %v2877_v13 = vld [vmem:[#allocation7 + $0xa0] sm:$0xf0] }
 0x175   : > { %v1080_v34 = vunpack.c.l.b16 %v894_v1  ;;  %v1081_v58 = vunpack.c.h.b16 %v894_v1  ;;  %v4006_v48 = vmax.f32 %v679_v21, 0.0  ;;  %v2804_v7 = vor.u32 %v2928_v36, %v2803_v43 }
 0x176   : > { %v4014_v1 = vpack.c.b16 %v1067_v39, %v1064_v31 }
 0x177   : > { %v4000_v6 = vpack.c.b16 %v1083_v42, %v1080_v34  ;;  %v4002_v19 = vpack.c.b16 %v1084_v37, %v1081_v58  ;;  %v822_v42 = vrot.slane %v3896_v10, 1  ;;  %1994 = vmatpush.bf16.msra.mxu1 %v2804_v7  ;;  %v748_v8 = vrot.slane %v4006_v48, 7  ;;  %v2926_v37 = vld [vmem:[#allocation7 + $0x22c] sm:$0xf]  ;;  %v2797_v34 = vld [vmem:[#allocation7 + $0x234] sm:$0xf0] }
 0x178   : > { %v2599_v10 = vld [vmem:[#allocation7 + $0x98] sm:$0xf]  ;;  %v2800_v62 = vor.u32 %v2926_v37, %v2797_v34 }
 0x179   : > { %v2600_v39 = vor.u32 %v2877_v13, %v2599_v10  ;;  %v833_v43 = vsel %vm829_vm3, %v812_v45, %v822_v42  ;;  %v2901_v10 = vld [vmem:[#allocation7 + $0x160] sm:$0xf0] }
 0x17a   : > { %v645_v44 = vpop.f32.mrf.mxu0  ;;  %1587 = vmatmul.bf16.gmra.mxu1 %v4000_v6  ;;  %1642 = vmatmul.bf16.gmra.mxu2 %v4002_v19  ;;  %v887_v37 = vpack.c.bf16 %v833_v43, %v833_v43 }
 0x17b   : > { %v680_v15 = vadd.f32 %v3703_v16, %v645_v44  ;;  %1750 = vmatmul.bf16.gmra.mxu0 %v4000_v6  ;;  %v843_v16 = vsel %vm829_vm3, %v822_v42, %v812_v45  ;;  %1829 = vmatpush.bf16.msrb.mxu2 %v2800_v62  ;;  %v823_v62 = vrot.slane %v3941_v63, 1  ;;  %v2773_v63 = vld [vmem:[#allocation7 + $0x204] sm:$0xf0] }
 0x17c   : > { %v861_v36 = vsel %vm808_vm5, %v843_v16, 0.0  ;;  %1885 = vmatpush.bf16.msrb.mxu3 %v2600_v39  ;;  %v1070_v42 = vunpack.c.l.b16 %v887_v37  ;;  %v2695_v16 = vld [vmem:[#allocation7 + $0x158] sm:$0xf]  ;;  %v2925_v39 = vld [vmem:[#allocation7 + $0x220] sm:$0xf0] }
 0x17d   : > { %v4011_v35 = vmax.f32 %v680_v15, 0.0  ;;  %v889_v34 = vpack.c.bf16 %v861_v36, %v861_v36  ;;  %v2696_v13 = vor.u32 %v2901_v10, %v2695_v16  ;;  %v2923_v36 = vld [vmem:[#allocation7 + $0x214] sm:$0xf]  ;;  %v2683_v37 = vld [vmem:[#allocation7 + $0x140] sm:$0xf] }
 0x17f   : > { %v758_v21 = vrot.slane %v4011_v35, 7  ;;  %v1073_v45 = vunpack.c.l.b16 %v889_v34  ;;  %1940 = vmatpush.bf16.msra.mxu0 %v2696_v13 }
 0x180   : > { %1682 = vmatmul.bf16.gmra.mxu3 %v4014_v1 }
 0x181   : > { %v769_v58 = vsel %vm762_vm1, %v748_v8, %v758_v21  ;;  %v779_v56 = vsel %vm762_vm1, %v758_v21, %v748_v8 }
 0x182   : > { %v900_v44 = vpack.c.bf16 %v4011_v35, %v769_v58  ;;  %v799_v31 = vsel %vm740_vm2, %v779_v56, 0.0 }
 0x183   : > { %v898_v15 = vpack.c.bf16 %v4006_v48, %v799_v31  ;;  %v4042_v31 = vpack.c.b16 %v1073_v45, %v1070_v42  ;;  %v2898_v45 = vld [vmem:[#allocation7 + $0x148] sm:$0xf0] }
 0x184   : > { %v1089_v7 = vunpack.c.l.b16 %v900_v44  ;;  %v1090_v20 = vunpack.c.h.b16 %v900_v44  ;;  %v813_v44 = vrot.slane %v3936_v0, 1  ;;  %v2684_v16 = vor.u32 %v2898_v45, %v2683_v37 }
 0x185   : > { %v1086_v8 = vunpack.c.l.b16 %v898_v15  ;;  %v1087_v21 = vunpack.c.h.b16 %v898_v15 }
 0x186   : > { %v844_v43 = vsel %vm829_vm3, %v823_v62, %v813_v44  ;;  %v834_v0 = vsel %vm829_vm3, %v813_v44, %v823_v62  ;;  %1941 = vmatpush.bf16.msra.mxu0 %v2684_v16 }
 0x187   : > { %v4033_v58 = vpack.c.b16 %v1089_v7, %v1086_v8  ;;  %v4035_v56 = vpack.c.b16 %v1090_v20, %v1087_v21  ;;  %v2791_v20 = vld [vmem:[#allocation7 + $0x218] sm:$0xf]  ;;  %v2785_v7 = vld [vmem:[#allocation7 + $0x21c] sm:$0xf0]  ;;  %v2920_v21 = vld [vmem:[#allocation7 + $0x1fc] sm:$0xf]  ;;  %v891_v10 = vpack.c.bf16 %v834_v0, %v834_v0 }
 0x188   : > { %v2792_v15 = vor.u32 %v2925_v39, %v2791_v20  ;;  %v2788_v8 = vor.u32 %v2923_v36, %v2785_v7  ;;  %v863_v34 = vsel %vm808_vm5, %v844_v43, 0.0  ;;  %v2776_v42 = vor.u32 %v2920_v21, %v2773_v63  ;;  %v2917_v20 = vld [vmem:[#allocation7 + $0x1e4] sm:$0xf]  ;;  %v2761_v39 = vld [vmem:[#allocation7 + $0x1ec] sm:$0xf0] }
 0x189   : > { %v893_v13 = vpack.c.bf16 %v863_v34, %v863_v34  ;;  %v2764_v36 = vor.u32 %v2917_v20, %v2761_v39  ;;  %v2895_v7 = vld [vmem:[#allocation7 + $0x130] sm:$0xf0]  ;;  %v1076_v62 = vunpack.c.l.b16 %v891_v10  ;;  %v2874_v21 = vld [vmem:[#allocation7 + $0x88] sm:$0xf0]  ;;  %v2749_v0 = vld [vmem:[#allocation7 + $0x1d4] sm:$0xf0]  ;;  %v845_v10 = vsel %vm829_vm3, %v824_v4, %v814_v57 }
 0x18a   : > { %1592 = vmatmul.bf16.gmra.mxu1 %v4033_v58  ;;  %1647 = vmatmul.bf16.gmra.mxu2 %v4035_v56  ;;  %v2914_v63 = vld [vmem:[#allocation7 + $0x1cc] sm:$0xf]  ;;  %v2659_v34 = vld [vmem:[#allocation7 + $0x110] sm:$0xf]  ;;  %v2737_v39 = vld [vmem:[#allocation7 + $0x1bc] sm:$0xf0] }
 0x18b   : > { %1755 = vmatmul.bf16.gmra.mxu0 %v4033_v58  ;;  %1995 = vmatpush.bf16.msra.mxu1 %v2792_v15  ;;  %v2671_v15 = vld [vmem:[#allocation7 + $0x128] sm:$0xf]  ;;  %v1079_v44 = vunpack.c.l.b16 %v893_v13  ;;  %v2752_v45 = vor.u32 %v2914_v63, %v2749_v0  ;;  %v2911_v13 = vld [vmem:[#allocation7 + $0x1b4] sm:$0xf]  ;;  %v865_v5 = vsel %vm808_vm5, %v845_v10, 0.0 }
 0x18c   : > { %1830 = vmatpush.bf16.msrb.mxu2 %v2788_v8  ;;  %v2672_v43 = vor.u32 %v2895_v7, %v2671_v15  ;;  %v2587_v8 = vld [vmem:[#allocation7 + $0x80] sm:$0xf]  ;;  %v2647_v15 = vld [vmem:[#allocation7 + $0xf8] sm:$0xf]  ;;  %v2889_v7 = vld [vmem:[#allocation7 + $0x100] sm:$0xf0] }
 0x18d   : > { %v2588_v37 = vor.u32 %v2874_v21, %v2587_v8  ;;  %v4056_v20 = vpack.c.b16 %v1079_v44, %v1076_v62  ;;  %v2922_v8 = vld [vmem:[#allocation7 + $0x208] sm:$0xf0]  ;;  %v2648_v62 = vor.u32 %v2889_v7, %v2647_v15  ;;  %v835_v21 = vsel %vm829_vm3, %v814_v57, %v824_v4  ;;  %v2908_v63 = vld [vmem:[#allocation7 + $0x19c] sm:$0xf]  ;;  %v2635_v0 = vld [vmem:[#allocation7 + $0xe0] sm:$0xf] }
 0x18e   : > { %1942 = vmatpush.bf16.msra.mxu0 %v2672_v43  ;;  %v2779_v43 = vld [vmem:[#allocation7 + $0x200] sm:$0xf]  ;;  %v2905_v10 = vld [vmem:[#allocation7 + $0x184] sm:$0xf]  ;;  %v2713_v15 = vld [vmem:[#allocation7 + $0x18c] sm:$0xf0] }
 0x18f   : > { %1886 = vmatpush.bf16.msrb.mxu3 %v2588_v37  ;;  %v2780_v44 = vor.u32 %v2922_v8, %v2779_v43  ;;  %v2725_v37 = vld [vmem:[#allocation7 + $0x1a4] sm:$0xf0]  ;;  %v2716_v43 = vor.u32 %v2905_v10, %v2713_v15  ;;  %v2883_v4 = vld [vmem:[#allocation7 + $0xd0] sm:$0xf0] }
 0x190   : > { %1687 = vmatmul.bf16.gmra.mxu3 %v4042_v31  ;;  %1831 = vmatpush.bf16.msrb.mxu2 %v2776_v42  ;;  %v2892_v42 = vld [vmem:[#allocation7 + $0x118] sm:$0xf0]  ;;  %v2623_v7 = vld [vmem:[#allocation7 + $0xc8] sm:$0xf] }
 0x191   : > { %v2660_v16 = vor.u32 %v2892_v42, %v2659_v34  ;;  %1996 = vmatpush.bf16.msra.mxu1 %v2780_v44  ;;  %v2728_v34 = vor.u32 %v2908_v63, %v2725_v37  ;;  %v2886_v42 = vld [vmem:[#allocation7 + $0xe8] sm:$0xf0]  ;;  %v2624_v8 = vor.u32 %v2883_v4, %v2623_v7  ;;  %v2575_v63 = vld [vmem:[#allocation7 + $0x68] sm:$0xf]  ;;  %v2871_v37 = vld [vmem:[#allocation7 + $0x70] sm:$0xf0] }
 0x192   : > { %v2767_v7 = vld [vmem:[#allocation7 + $0x1e8] sm:$0xf] }
 0x193   : > { %1943 = vmatpush.bf16.msra.mxu0 %v2660_v16  ;;  %v895_v16 = vpack.c.bf16 %v835_v21, %v835_v21 }
 0x194   : > { %1832 = vmatpush.bf16.msrb.mxu2 %v2764_v36  ;;  %v2740_v36 = vor.u32 %v2911_v13, %v2737_v39  ;;  %v897_v13 = vpack.c.bf16 %v865_v5, %v865_v5  ;;  %v825_v5 = vrot.slane %v4011_v35, 1 }
 0x195   : > { %v1082_v57 = vunpack.c.l.b16 %v895_v16 }
 0x197   : > { %1944 = vmatpush.bf16.msra.mxu0 %v2648_v62  ;;  %v815_v62 = vrot.slane %v4006_v48, 1 }
 0x198   : > { %1833 = vmatpush.bf16.msrb.mxu2 %v2752_v45  ;;  %v2636_v45 = vor.u32 %v2886_v42, %v2635_v0 }
 0x199   : > { %v836_v48 = vsel %vm829_vm3, %v815_v62, %v825_v5 }
 0x19a   : > { %1652 = vmatmul.bf16.gmra.mxu2 %v3826_v18  ;;  %1782 = vmatmul.bf16.vlgmr.msrb.gmra.mxu1 %v3745_v25  ;;  %v899_v10 = vpack.c.bf16 %v836_v48, %v836_v48 }
 0x19b   : > { %1760 = vmatmul.bf16.gmra.mxu0 %v3763_v51 }
 0x19c   : > { %1834 = vmatpush.bf16.msrb.mxu2 %v2740_v36  ;;  %1945 = vmatpush.bf16.msra.mxu0 %v2636_v45  ;;  %v1085_v36 = vunpack.c.l.b16 %v897_v13  ;;  %v846_v45 = vsel %vm829_vm3, %v825_v5, %v815_v62  ;;  %v1088_v32 = vunpack.c.l.b16 %v899_v10 }
 0x19d   : > { %v867_v16 = vsel %vm808_vm5, %v846_v45, 0.0 }
 0x19e   : > { %v4072_v21 = vpack.c.b16 %v1085_v36, %v1082_v57  ;;  %v901_v15 = vpack.c.bf16 %v867_v16, %v867_v16 }
 0x1a0   : > { %1692 = vmatmul.bf16.gmra.mxu3 %v4056_v20  ;;  %1835 = vmatpush.bf16.msrb.mxu2 %v2728_v34  ;;  %v2576_v34 = vor.u32 %v2871_v37, %v2575_v63 }
 0x1a1   : > { %1946 = vmatpush.bf16.msra.mxu0 %v2624_v8  ;;  %v1091_v8 = vunpack.c.l.b16 %v901_v15 }
 0x1a2   : > { %1887 = vmatpush.bf16.msrb.mxu3 %v2576_v34  ;;  %v2868_v34 = vld [vmem:[#allocation7 + $0x58] sm:$0xf0] }
 0x1a3   : > { %v4094_v62 = vpack.c.b16 %v1091_v8, %v1088_v32 }
 0x1a4   : > { %1836 = vmatpush.bf16.msrb.mxu2 %v2716_v43  ;;  %v2919_v43 = vld [vmem:[#allocation7 + $0x1f0] sm:$0xf0] }
 0x1a5   : > { %v2768_v57 = vor.u32 %v2919_v43, %v2767_v7  ;;  %v2755_v7 = vld [vmem:[#allocation7 + $0x1d0] sm:$0xf]  ;;  %v2916_v43 = vld [vmem:[#allocation7 + $0x1d8] sm:$0xf0] }
 0x1a7   : > { %v1563_v39 = vpop.f32.mrf.mxu1  ;;  %1997 = vmatpush.bf16.msra.mxu1 %v2768_v57 }
 0x1a8   : > { %v1728_v3 = vpop.f32.mrf.mxu0 }
 0x1aa   : > { %1657 = vmatmul.bf16.gmra.mxu2 %v3891_v27  ;;  %1785 = vmatmul.bf16.gmra.mxu1 %v3802_v47 }
 0x1ab   : > { %1765 = vmatmul.bf16.gmra.mxu0 %v3835_v30 }
 0x1ad   : > { %v1618_v3 = vpop.f32.mrf.mxu2 }
 0x1ae   : > { %v4070_v44 = vadd.f32 %v1618_v3, %v1563_v39 }
 0x1af   : > { %v1565_v0 = vpop.f32.mrf.mxu1 }
 0x1b0   : > { %v1729_v42 = vpop.f32.mrf.mxu0  ;;  %1697 = vmatmul.bf16.gmra.mxu3 %v4072_v21 }
 0x1b2   : > { %v4077_v35 = vpop.f32.mrf.mxu3 }
 0x1b5   : > { %v1620_v13 = vpop.f32.mrf.mxu2 }
 0x1b6   : > { %v4083_v39 = vadd.f32 %v1620_v13, %v1565_v0  ;;  %v2563_v0 = vld [vmem:[#allocation7 + $0x50] sm:$0xf] }
 0x1b7   : > { %v1568_v4 = vpop.f32.mrf.mxu1  ;;  %v2564_v42 = vor.u32 %v2868_v34, %v2563_v0 }
 0x1b8   : > { %v4085_v36 = vpop.f32.mrf.mxu0 }
 0x1b9   : > { %1888 = vmatpush.bf16.msrb.mxu3 %v2564_v42  ;;  %v2551_v42 = vld [vmem:[#allocation7 + $0x38] sm:$0xf] }
 0x1ba   : > { %1660 = vmatmul.bf16.gmra.mxu2 %v3930_v52  ;;  %1790 = vmatmul.bf16.gmra.mxu1 %v3866_v29  ;;  %v4089_v33 = vpop.f32.mrf.mxu3 }
 0x1bb   : > { %1770 = vmatmul.bf16.gmra.mxu0 %v3900_v14 }
 0x1bd   : > { %v1623_v5 = vpop.f32.mrf.mxu2 }
 0x1be   : > { %v4092_v3 = vadd.f32 %v1623_v5, %v1568_v4  ;;  %v2756_v4 = vor.u32 %v2916_v43, %v2755_v7  ;;  %v2539_v7 = vld [vmem:[#allocation7 + $0x20] sm:$0xf]  ;;  %v2862_v43 = vld [vmem:[#allocation7 + $0x28] sm:$0xf0] }
 0x1bf   : > { %v1570_v63 = vpop.f32.mrf.mxu1 }
 0x1c0   : > { %v4096_v37 = vpop.f32.mrf.mxu0  ;;  %1702 = vmatmul.bf16.gmra.mxu3 %v4094_v62  ;;  %1998 = vmatpush.bf16.msra.mxu1 %v2756_v4 }
 0x1c2   : > { %v1603_v45 = vpop.f32.mrf.mxu3 }
 0x1c3   : > { %v2865_v45 = vld [vmem:[#allocation7 + $0x40] sm:$0xf0] }
 0x1c5   : > { %v1625_v48 = vpop.f32.mrf.mxu2 }
 0x1c6   : > { %v4099_v16 = vadd.f32 %v1625_v48, %v1570_v63  ;;  %v2552_v48 = vor.u32 %v2865_v45, %v2551_v42  ;;  %v2743_v42 = vld [vmem:[#allocation7 + $0x1b8] sm:$0xf] }
 0x1c7   : > { %v1573_v13 = vpop.f32.mrf.mxu1 }
 0x1c8   : > { %v4101_v10 = vpop.f32.mrf.mxu0  ;;  %1889 = vmatpush.bf16.msrb.mxu3 %v2552_v48  ;;  %v2744_v48 = vor.u32 %v2913_v49, %v2743_v42  ;;  %v2731_v42 = vld [vmem:[#allocation7 + $0x1a0] sm:$0xf] }
 0x1ca   : > { %1795 = vmatmul.bf16.gmra.mxu1 %v3928_v53  ;;  %1837 = vmatmul.bf16.vlgmr.msrb.gmra.mxu2 %v3946_v9  ;;  %v1604_v15 = vpop.f32.mrf.mxu3 }
 0x1cb   : > { %1947 = vmatmul.bf16.vlgmr.msra.gmra.mxu0 %v3745_v25  ;;  %1999 = vmatpush.bf16.msra.mxu1 %v2744_v48 }
 0x1cd   : > { %v1628_v57 = vpop.f32.mrf.mxu2 }
 0x1ce   : > { %v4106_v32 = vadd.f32 %v1628_v57, %v1573_v13  ;;  %v2540_v13 = vor.u32 %v2862_v43, %v2539_v7 }
 0x1cf   : > { %v1575_v8 = vpop.f32.mrf.mxu1 }
 0x1d0   : > { %v4108_v5 = vpop.f32.mrf.mxu0  ;;  %1707 = vmatmul.bf16.gmra.mxu3 %v3878_v55 }
 0x1d1   : > { %1890 = vmatpush.bf16.msrb.mxu3 %v2540_v13 }
 0x1d3   : > { %v1606_v63 = vpop.f32.mrf.mxu3 }
 0x1d4   : > { %v2527_v63 = vld [vmem:[#allocation7 + $0x8] sm:$0xf] }
 0x1d5   : > { %v1630_v0 = vpop.f32.mrf.mxu2 }
 0x1d6   : > { %v4111_v34 = vadd.f32 %v1630_v0, %v1575_v8  ;;  %v2859_v0 = vld [vmem:[#allocation7 + $0x10] sm:$0xf0] }
 0x1d7   : > { %v1578_v25 = vpop.f32.mrf.mxu1  ;;  %v2528_v54 = vor.u32 %v2859_v0, %v2527_v63 }
 0x1d8   : > { %v4113_v15 = vpop.f32.mrf.mxu0 }
 0x1d9   : > { %1891 = vmatpush.bf16.msrb.mxu3 %v2528_v54 }
 0x1da   : > { %1800 = vmatmul.bf16.gmra.mxu1 %v3968_v26  ;;  %1840 = vmatmul.bf16.gmra.mxu2 %v3980_v59 }
 0x1db   : > { %1950 = vmatmul.bf16.gmra.mxu0 %v3802_v47  ;;  %v1607_v4 = vpop.f32.mrf.mxu3 }
 0x1dd   : > { %v1633_v57 = vpop.f32.mrf.mxu2 }
 0x1de   : > { %v4118_v8 = vadd.f32 %v1633_v57, %v1578_v25 }
 0x1df   : > { %v1580_v45 = vpop.f32.mrf.mxu1 }
 0x1e0   : > { %v4120_v24 = vpop.f32.mrf.mxu0  ;;  %1712 = vmatmul.bf16.gmra.mxu3 %v3905_v17 }
 0x1e3   : > { %v1673_v7 = vpop.f32.mrf.mxu3 }
 0x1e4   : > { %v4124_v47 = vadd.f32 %v1673_v7, %v4070_v44 }
 0x1e5   : > { %v1635_v43 = vpop.f32.mrf.mxu2 }
 0x1e6   : > { %v4126_v25 = vadd.f32 %v1635_v43, %v1580_v45  ;;  %v2910_v45 = vld [vmem:[#allocation7 + $0x1a8] sm:$0xf0] }
 0x1e7   : > { %v1583_v13 = vpop.f32.mrf.mxu1  ;;  %v2732_v48 = vor.u32 %v2910_v45, %v2731_v42 }
 0x1e8   : > { %v4128_v4 = vpop.f32.mrf.mxu0 }
 0x1e9   : > { %2000 = vmatpush.bf16.msra.mxu1 %v2732_v48 }
 0x1ea   : > { %1805 = vmatmul.bf16.gmra.mxu1 %v4002_v19  ;;  %1845 = vmatmul.bf16.gmra.mxu2 %v4014_v1 }
 0x1eb   : > { %1953 = vmatmul.bf16.gmra.mxu0 %v3866_v29  ;;  %v1675_v57 = vpop.f32.mrf.mxu3 }
 0x1ec   : > { %v4134_v49 = vadd.f32 %v1675_v57, %v4083_v39 }
 0x1ed   : > { %v1638_v54 = vpop.f32.mrf.mxu2  ;;  %2001 = vmatpush.bf16.msra.mxu1 %v2720_v60 }
 0x1ee   : > { %v1639_v63 = vadd.f32 %v1638_v54, %v1583_v13 }
 0x1ef   : > { %v1585_v44 = vpop.f32.mrf.mxu1 }
 0x1f0   : > { %v4136_v0 = vpop.f32.mrf.mxu0  ;;  %1715 = vmatmul.bf16.gmra.mxu3 %v3943_v2 }
 0x1f3   : > { %v1678_v7 = vpop.f32.mrf.mxu3 }
 0x1f4   : > { %v4140_v43 = vadd.f32 %v1678_v7, %v4092_v3 }
 0x1f5   : > { %v1640_v29 = vpop.f32.mrf.mxu2 }
 0x1f6   : > { %v1641_v23 = vadd.f32 %v1640_v29, %v1585_v44 }
 0x1f7   : > { %v1588_v12 = vpop.f32.mrf.mxu1 }
 0x1f8   : > { %v4142_v39 = vpop.f32.mrf.mxu0 }
 0x1fa   : > { %1810 = vmatmul.bf16.gmra.mxu1 %v4035_v56  ;;  %1850 = vmatmul.bf16.gmra.mxu2 %v4042_v31 }
 0x1fb   : > { %1958 = vmatmul.bf16.gmra.mxu0 %v3928_v53  ;;  %v1680_v13 = vpop.f32.mrf.mxu3 }
 0x1fc   : > { %v4148_v57 = vadd.f32 %v1680_v13, %v4099_v16 }
 0x1fd   : > { %v1643_v54 = vpop.f32.mrf.mxu2 }
 0x1fe   : > { %v1644_v42 = vadd.f32 %v1643_v54, %v1588_v12 }
 0x1ff   : > { %v1590_v45 = vpop.f32.mrf.mxu1 }
 0x200   : > { %v4150_v3 = vpop.f32.mrf.mxu0  ;;  %1892 = vmatmul.bf16.vlgmr.msrb.gmra.mxu3 %v3743_v22 }
 0x203   : > { %v1683_v44 = vpop.f32.mrf.mxu3 }
 0x204   : > { %v4154_v48 = vadd.f32 %v1683_v44, %v4106_v32 }
 0x205   : > { %v1645_v7 = vpop.f32.mrf.mxu2 }
 0x206   : > { %v1646_v29 = vadd.f32 %v1645_v7, %v1590_v45 }
 0x207   : > { %v1593_v53 = vpop.f32.mrf.mxu1 }
 0x208   : > { %v4156_v41 = vpop.f32.mrf.mxu0 }
 0x20a   : > { %1815 = vmatmul.bf16.gmra.mxu1 %v3826_v18  ;;  %1855 = vmatmul.bf16.gmra.mxu2 %v4056_v20 }
 0x20b   : > { %1963 = vmatmul.bf16.gmra.mxu0 %v3968_v26  ;;  %v1685_v12 = vpop.f32.mrf.mxu3 }
 0x20c   : > { %v4162_v22 = vadd.f32 %v1685_v12, %v4111_v34 }
 0x20d   : > { %v1648_v16 = vpop.f32.mrf.mxu2 }
 0x20e   : > { %v1649_v32 = vadd.f32 %v1648_v16, %v1593_v53 }
 0x20f   : > { %v1595_v13 = vpop.f32.mrf.mxu1 }
 0x210   : > { %v4164_v54 = vpop.f32.mrf.mxu0  ;;  %1895 = vmatmul.bf16.gmra.mxu3 %v3796_v38 }
 0x213   : > { %v1688_v61 = vpop.f32.mrf.mxu3 }
 0x214   : > { %v4168_v60 = vadd.f32 %v1688_v61, %v4118_v8 }
 0x215   : > { %v1650_v11 = vpop.f32.mrf.mxu2 }
 0x216   : > { %v1651_v45 = vadd.f32 %v1650_v11, %v1595_v13 }
 0x217   : > { %v1783_v44 = vpop.f32.mrf.mxu1 }
 0x218   : > { %v4170_v7 = vpop.f32.mrf.mxu0 }
 0x21a   : > { %1820 = vmatmul.bf16.gmra.mxu1 %v3891_v27  ;;  %1860 = vmatmul.bf16.gmra.mxu2 %v4072_v21 }
 0x21b   : > { %1968 = vmatmul.bf16.gmra.mxu0 %v4002_v19  ;;  %v1690_v26 = vpop.f32.mrf.mxu3 }
 0x21c   : > { %v4176_v34 = vadd.f32 %v1690_v26, %v4126_v25 }
 0x21d   : > { %v1653_v38 = vpop.f32.mrf.mxu2 }
 0x21f   : > { %v1784_v53 = vpop.f32.mrf.mxu1 }
 0x220   : > { %v4178_v12 = vpop.f32.mrf.mxu0  ;;  %1898 = vmatmul.bf16.gmra.mxu3 %v3864_v28 }
 0x221   : > { %4492 = vst [vmem:[#allocation49_spill] sm:$0xff] %v4178_v12 }
 0x223   : > { %v1693_v8 = vpop.f32.mrf.mxu3 }
 0x224   : > { %v4181_v16 = vadd.f32 %v1693_v8, %v1639_v63 }
 0x225   : > { %v1655_v13 = vpop.f32.mrf.mxu2 }
 0x227   : > { %v1786_v61 = vpop.f32.mrf.mxu1 }
 0x228   : > { %v4183_v11 = vpop.f32.mrf.mxu0 }
 0x229   : > { %4493 = vst [vmem:[#allocation50_spill] sm:$0xff] %v4183_v11 }
 0x22a   : > { %1825 = vmatmul.bf16.gmra.mxu1 %v3930_v52  ;;  %1865 = vmatmul.bf16.gmra.mxu2 %v4094_v62 }
 0x22b   : > { %1973 = vmatmul.bf16.gmra.mxu0 %v4035_v56  ;;  %v1695_v19 = vpop.f32.mrf.mxu3  ;;  %v2936_v56 = vld [vmem:[#allocation9 + $0x38] sm:$0xff] }
 0x22c   : > { %v4188_v25 = vadd.f32 %v1695_v19, %v1641_v23  ;;  %2189 = vmatpush.bf16.msra.mxu2 %v2936_v56  ;;  %3003 = vmatpush.bf16.msra.mxu3 %v2936_v56 }
 0x22d   : > { %v1658_v44 = vpop.f32.mrf.mxu2 }
 0x22f   : > { %v1788_v26 = vpop.f32.mrf.mxu1 }
 0x230   : > { %v4190_v53 = vpop.f32.mrf.mxu0  ;;  %1903 = vmatmul.bf16.gmra.mxu3 %v3926_v46 }
 0x231   : > { %4494 = vst [vmem:[#allocation51_spill] sm:$0xff] %v4190_v53 }
 0x233   : > { %v1698_v28 = vpop.f32.mrf.mxu3 }
 0x234   : > { %v4193_v63 = vadd.f32 %v1698_v28, %v1644_v42 }
 0x235   : > { %v1659_v8 = vpop.f32.mrf.mxu2 }
 0x237   : > { %v1791_v40 = vpop.f32.mrf.mxu1 }
 0x238   : > { %v1771_v11 = vpop.f32.mrf.mxu0 }
 0x23a   : > { %1870 = vmatmul.bf16.gmra.mxu2 %v3878_v55  ;;  %2002 = vmatmul.bf16.vlgmr.msra.gmra.mxu1 %v3946_v9 }
 0x23b   : > { %1978 = vmatmul.bf16.gmra.mxu0 %v3826_v18  ;;  %v1700_v23 = vpop.f32.mrf.mxu3 }
 0x23c   : > { %v4198_v19 = vadd.f32 %v1700_v23, %v1646_v29 }
 0x23d   : > { %v1661_v44 = vpop.f32.mrf.mxu2 }
 0x23f   : > { %v1793_v46 = vpop.f32.mrf.mxu1 }
 0x240   : > { %v1772_v53 = vpop.f32.mrf.mxu0  ;;  %1908 = vmatmul.bf16.gmra.mxu3 %v3966_v50  ;;  %v2935_v50 = vld [vmem:[#allocation9 + $0x30] sm:$0xff] }
 0x241   : > { %2190 = vmatpush.bf16.msra.mxu2 %v2935_v50  ;;  %3004 = vmatpush.bf16.msra.mxu3 %v2935_v50 }
 0x243   : > { %v1703_v42 = vpop.f32.mrf.mxu3 }
 0x244   : > { %v4201_v28 = vadd.f32 %v1703_v42, %v1649_v32  ;;  %v1654_v32 = vadd.f32 %v1653_v38, %v4077_v35 }
 0x245   : > { %v1662_v11 = vpop.f32.mrf.mxu2 }
 0x247   : > { %v1796_v8 = vpop.f32.mrf.mxu1 }
 0x248   : > { %v1948_v12 = vpop.f32.mrf.mxu0 }
 0x24a   : > { %1875 = vmatmul.bf16.gmra.mxu2 %v3905_v17  ;;  %2005 = vmatmul.bf16.gmra.mxu1 %v3980_v59 }
 0x24b   : > { %1983 = vmatmul.bf16.gmra.mxu0 %v3891_v27  ;;  %v1705_v18 = vpop.f32.mrf.mxu3  ;;  %v1656_v27 = vadd.f32 %v1655_v13, %v4089_v33  ;;  %v2934_v33 = vld [vmem:[#allocation9 + $0x28] sm:$0xff] }
 0x24c   : > { %v4206_v9 = vadd.f32 %v1705_v18, %v1651_v45  ;;  %v1787_v45 = vadd.f32 %v1786_v61, %v4085_v36  ;;  %2191 = vmatpush.bf16.msra.mxu2 %v2934_v33  ;;  %3005 = vmatpush.bf16.msra.mxu3 %v2934_v33 }
 0x24d   : > { %v1838_v29 = vpop.f32.mrf.mxu2 }
 0x24f   : > { %v1798_v23 = vpop.f32.mrf.mxu1 }
 0x250   : > { %v1949_v53 = vpop.f32.mrf.mxu0  ;;  %1913 = vmatmul.bf16.gmra.mxu3 %v4000_v6 }
 0x253   : > { %v1708_v12 = vpop.f32.mrf.mxu3 }
 0x254   : > { %v4210_v56 = vadd.f32 %v1708_v12, %v1654_v32 }
 0x255   : > { %v1839_v44 = vpop.f32.mrf.mxu2 }
 0x257   : > { %v1801_v59 = vpop.f32.mrf.mxu1 }
 0x258   : > { %v1951_v42 = vpop.f32.mrf.mxu0 }
 0x25a   : > { %1880 = vmatmul.bf16.gmra.mxu2 %v3943_v2  ;;  %2008 = vmatmul.bf16.gmra.mxu1 %v4014_v1 }
 0x25b   : > { %1988 = vmatmul.bf16.gmra.mxu0 %v3930_v52  ;;  %v1710_v6 = vpop.f32.mrf.mxu3  ;;  %v1789_v52 = vadd.f32 %v1788_v26, %v4096_v37  ;;  %v1794_v26 = vadd.f32 %v1793_v46, %v4108_v5 }
 0x25c   : > { %v4217_v35 = vadd.f32 %v1710_v6, %v1656_v27 }
 0x25d   : > { %v1841_v38 = vpop.f32.mrf.mxu2 }
 0x25e   : > { %v1842_v11 = vadd.f32 %v1841_v38, %v1787_v45 }
 0x25f   : > { %v1803_v18 = vpop.f32.mrf.mxu1 }
 0x260   : > { %v4220_v29 = vadd.f32 %v1842_v11, %v4124_v47  ;;  %v1952_v53 = vpop.f32.mrf.mxu0  ;;  %1918 = vmatmul.bf16.gmra.mxu3 %v4033_v58  ;;  %v1792_v47 = vadd.f32 %v1791_v40, %v4101_v10  ;;  %v1797_v10 = vadd.f32 %v1796_v8, %v4113_v15  ;;  %v2932_v15 = vld [vmem:[#allocation9 + $0x18] sm:$0xff] }
 0x263   : > { %v1713_v1 = vpop.f32.mrf.mxu3 }
 0x264   : > { %v1802_v1 = vadd.f32 %v1801_v59, %v4128_v4 }
 0x265   : > { %v1843_v13 = vpop.f32.mrf.mxu2 }
 0x266   : > { %v1844_v50 = vadd.f32 %v1843_v13, %v1789_v52 }
 0x267   : > { %v1806_v36 = vpop.f32.mrf.mxu1 }
 0x268   : > { %v4225_v61 = vadd.f32 %v1844_v50, %v4134_v49  ;;  %v1807_v59 = vadd.f32 %v1806_v36, %v4142_v39 }
 0x26a   : > { %2013 = vmatmul.bf16.gmra.mxu1 %v4042_v31  ;;  %v2933_v31 = vld [vmem:[#allocation9 + $0x20] sm:$0xff] }
 0x26b   : > { %v1714_v32 = vpop.f32.mrf.mxu3  ;;  %2192 = vmatpush.bf16.msra.mxu2 %v2933_v31  ;;  %3006 = vmatpush.bf16.msra.mxu3 %v2933_v31 }
 0x26d   : > { %v1846_v12 = vpop.f32.mrf.mxu2 }
 0x26e   : > { %v1847_v44 = vadd.f32 %v1846_v12, %v1792_v47 }
 0x26f   : > { %v1808_v58 = vpop.f32.mrf.mxu1  ;;  %2193 = vmatpush.bf16.msra.mxu2 %v2932_v15  ;;  %3007 = vmatpush.bf16.msra.mxu3 %v2932_v15 }
 0x270   : > { %v4230_v42 = vadd.f32 %v1847_v44, %v4140_v43  ;;  %1923 = vmatmul.bf16.gmra.mxu3 %v3763_v51 }
 0x273   : > { %v1716_v37 = vpop.f32.mrf.mxu3 }
 0x275   : > { %v1848_v27 = vpop.f32.mrf.mxu2 }
 0x276   : > { %v1849_v6 = vadd.f32 %v1848_v27, %v1794_v26 }
 0x277   : > { %v1811_v49 = vpop.f32.mrf.mxu1 }
 0x278   : > { %v4235_v45 = vadd.f32 %v1849_v6, %v4148_v57  ;;  %v1799_v57 = vadd.f32 %v1798_v23, %v4120_v24  ;;  %v2930_v6 = vld [vmem:[#allocation9 + $0x8] sm:$0xff] }
 0x27a   : > { %2018 = vmatmul.bf16.gmra.mxu1 %v4056_v20 }
 0x27b   : > { %v1717_v40 = vpop.f32.mrf.mxu3 }
 0x27d   : > { %v1851_v43 = vpop.f32.mrf.mxu2 }
 0x27e   : > { %v1852_v38 = vadd.f32 %v1851_v43, %v1797_v10 }
 0x27f   : > { %v1813_v51 = vpop.f32.mrf.mxu1 }
 0x280   : > { %v4240_v11 = vadd.f32 %v1852_v38, %v4154_v48  ;;  %1928 = vmatmul.bf16.gmra.mxu3 %v3835_v30 }
 0x283   : > { %v1893_v5 = vpop.f32.mrf.mxu3 }
 0x285   : > { %v1853_v46 = vpop.f32.mrf.mxu2 }
 0x286   : > { %v1854_v53 = vadd.f32 %v1853_v46, %v1799_v57 }
 0x287   : > { %v1816_v33 = vpop.f32.mrf.mxu1 }
 0x288   : > { %v4245_v20 = vadd.f32 %v1854_v53, %v4162_v22  ;;  %v1804_v22 = vadd.f32 %v1803_v18, %v4136_v0  ;;  %v1809_v0 = vadd.f32 %v1808_v58, %v4150_v3  ;;  %v1814_v3 = vadd.f32 %v1813_v51, %v4164_v54  ;;  %v4495_v51 = vld [vmem:[#allocation49_spill] sm:$0xff] }
 0x28a   : > { %2023 = vmatmul.bf16.gmra.mxu1 %v4072_v21 }
 0x28b   : > { %v1894_v8 = vpop.f32.mrf.mxu3 }
 0x28c   : > { %v2929_v8 = vld [vmem:[#allocation9] sm:$0xff] }
 0x28d   : > { %v1856_v48 = vpop.f32.mrf.mxu2 }
 0x28e   : > { %v1857_v52 = vadd.f32 %v1856_v48, %v1802_v1 }
 0x28f   : > { %v1818_v30 = vpop.f32.mrf.mxu1 }
 0x290   : > { %v4250_v13 = vadd.f32 %v1857_v52, %v4168_v60  ;;  %1933 = vmatmul.bf16.gmra.mxu3 %v3900_v14  ;;  %v2931_v14 = vld [vmem:[#allocation9 + $0x10] sm:$0xff]  ;;  %v1819_v57 = vadd.f32 %v1818_v30, %v4495_v51 }
 0x291   : > { %2194 = vmatpush.bf16.msra.mxu2 %v2931_v14  ;;  %3008 = vmatpush.bf16.msra.mxu3 %v2931_v14 }
 0x293   : > { %v1896_v24 = vpop.f32.mrf.mxu3 }
 0x295   : > { %v1858_v23 = vpop.f32.mrf.mxu2  ;;  %2195 = vmatpush.bf16.msra.mxu2 %v2930_v6  ;;  %3009 = vmatpush.bf16.msra.mxu3 %v2930_v6 }
 0x296   : > { %v1859_v50 = vadd.f32 %v1858_v23, %v1804_v22  ;;  %v4497_v22 = vld [vmem:[#allocation51_spill] sm:$0xff] }
 0x297   : > { %v1821_v21 = vpop.f32.mrf.mxu1 }
 0x298   : > { %v4255_v32 = vadd.f32 %v1859_v50, %v4176_v34 }
 0x299   : > { %2196 = vmatpush.bf16.msra.mxu2 %v2929_v8  ;;  %3010 = vmatpush.bf16.msra.mxu3 %v2929_v8 }
 0x29a   : > { %2028 = vmatmul.bf16.gmra.mxu1 %v4094_v62  ;;  %v1812_v62 = vadd.f32 %v1811_v49, %v4156_v41  ;;  %v1817_v41 = vadd.f32 %v1816_v33, %v4170_v7  ;;  %v4496_v33 = vld [vmem:[#allocation50_spill] sm:$0xff] }
 0x29b   : > { %v1897_v4 = vpop.f32.mrf.mxu3  ;;  %v1822_v1 = vadd.f32 %v1821_v21, %v4496_v33 }
 0x29d   : > { %v1861_v47 = vpop.f32.mrf.mxu2 }
 0x29e   : > { %v1862_v12 = vadd.f32 %v1861_v47, %v1807_v59 }
 0x29f   : > { %v1823_v60 = vpop.f32.mrf.mxu1 }
 0x2a0   : > { %v4260_v44 = vadd.f32 %v1862_v12, %v4181_v16  ;;  %v1824_v23 = vadd.f32 %v1823_v60, %v4497_v22 }
 0x2a3   : > { %v1899_v58 = vpop.f32.mrf.mxu3 }
 0x2a5   : > { %v1863_v18 = vpop.f32.mrf.mxu2 }
 0x2a6   : > { %v1864_v37 = vadd.f32 %v1863_v18, %v1809_v0 }
 0x2a7   : > { %v1826_v34 = vpop.f32.mrf.mxu1 }
 0x2a8   : > { %v4264_v26 = vadd.f32 %v1864_v37, %v4188_v25  ;;  %v1954_v25 = vpop.f32.mrf.mxu0 }
 0x2a9   : > { %v1955_v47 = vadd.f32 %v1954_v25, %v1899_v58 }
 0x2aa   : > { %2033 = vmatmul.bf16.gmra.mxu1 %v3878_v55 }
 0x2ab   : > { %v1901_v43 = vpop.f32.mrf.mxu3 }
 0x2ad   : > { %v1866_v39 = vpop.f32.mrf.mxu2 }
 0x2ae   : > { %v1867_v36 = vadd.f32 %v1866_v39, %v1812_v62 }
 0x2af   : > { %v1827_v27 = vpop.f32.mrf.mxu1 }
 0x2b0   : > { %v4269_v16 = vadd.f32 %v1867_v36, %v4193_v63  ;;  %v1956_v54 = vpop.f32.mrf.mxu0 }
 0x2b1   : > { %v1957_v0 = vadd.f32 %v1956_v54, %v1901_v43 }
 0x2b5   : > { %v1868_v31 = vpop.f32.mrf.mxu2 }
 0x2b6   : > { %v1869_v40 = vadd.f32 %v1868_v31, %v1814_v3 }
 0x2b7   : > { %v2003_v10 = vpop.f32.mrf.mxu1 }
 0x2b8   : > { %v4273_v55 = vadd.f32 %v1869_v40, %v4198_v19  ;;  %v1959_v7 = vpop.f32.mrf.mxu0 }
 0x2ba   : > { %2038 = vmatmul.bf16.gmra.mxu1 %v3905_v17  ;;  %v1904_v17 = vpop.f32.mrf.mxu3 }
 0x2bd   : > { %v1871_v49 = vpop.f32.mrf.mxu2 }
 0x2be   : > { %v1872_v63 = vadd.f32 %v1871_v49, %v1817_v41 }
 0x2bf   : > { %v2004_v38 = vpop.f32.mrf.mxu1 }
 0x2c0   : > { %v4278_v5 = vadd.f32 %v1872_v63, %v4201_v28 }
 0x2c2   : > { %v1906_v24 = vpop.f32.mrf.mxu3 }
 0x2c5   : > { %v1873_v46 = vpop.f32.mrf.mxu2 }
 0x2c6   : > { %v1874_v53 = vadd.f32 %v1873_v46, %v1819_v57 }
 0x2c7   : > { %v2006_v15 = vpop.f32.mrf.mxu1 }
 0x2c8   : > { %v4282_v19 = vadd.f32 %v1874_v53, %v4206_v9  ;;  %v1961_v9 = vpop.f32.mrf.mxu0 }
 0x2c9   : > { %v1962_v10 = vadd.f32 %v1961_v9, %v1906_v24 }
 0x2ca   : > { %2043 = vmatmul.bf16.gmra.mxu1 %v3943_v2  ;;  %v1909_v14 = vpop.f32.mrf.mxu3 }
 0x2cd   : > { %v1876_v28 = vpop.f32.mrf.mxu2 }
 0x2ce   : > { %v1877_v48 = vadd.f32 %v1876_v28, %v1822_v1 }
 0x2cf   : > { %v2007_v52 = vpop.f32.mrf.mxu1 }
 0x2d0   : > { %v4287_v30 = vadd.f32 %v1877_v48, %v4210_v56  ;;  %v4297_v56 = vld [vmem:[%s4432_s4] ss:$0 sm:$0xff]  ;;  %v1964_v60 = vpop.f32.mrf.mxu0 }
 0x2d1   : > { %v1965_v15 = vadd.f32 %v1964_v60, %v1909_v14 }
 0x2d2   : > { %v1911_v3 = vpop.f32.mrf.mxu3 }
 0x2d5   : > { %v1878_v50 = vpop.f32.mrf.mxu2 }
 0x2d6   : > { %v1879_v4 = vadd.f32 %v1878_v50, %v1824_v23 }
 0x2d7   : > { %v2009_v59 = vpop.f32.mrf.mxu1 }
 0x2d8   : > { %v4291_v2 = vadd.f32 %v1879_v4, %v4217_v35  ;;  %v2010_v12 = vadd.f32 %v2009_v59, %v1955_v47  ;;  %v1966_v40 = vpop.f32.mrf.mxu0 }
 0x2da   : > { %v2065_v18 = vadd.f32 %v4220_v29, %v2010_v12  ;;  %v1960_v29 = vadd.f32 %v1959_v7, %v1904_v17  ;;  %v1914_v43 = vpop.f32.mrf.mxu3 }
 0x2dc   : > { %v2085_v62 = vadd.f32 %v4297_v56, %v2065_v18 }
 0x2dd   : > { %v1881_v21 = vpop.f32.mrf.mxu2 }
 0x2de   : > { %v2101_v27 = vmax.f32 %v2085_v62, 0.0 }
 0x2df   : > { %v2011_v37 = vpop.f32.mrf.mxu1 }
 0x2e0   : > { %v2012_v34 = vadd.f32 %v2011_v37, %v1957_v0  ;;  %v1969_v54 = vpop.f32.mrf.mxu0 }
 0x2e1   : > { %v1970_v59 = vadd.f32 %v1969_v54, %v1914_v43 }
 0x2e2   : > { %v2066_v39 = vadd.f32 %v4225_v61, %v2012_v34  ;;  %v1916_v7 = vpop.f32.mrf.mxu3 }
 0x2e4   : > { %v2086_v35 = vadd.f32 %v4297_v56, %v2066_v39 }
 0x2e5   : > { %v1882_v36 = vpop.f32.mrf.mxu2 }
 0x2e6   : > { %v2102_v6 = vmax.f32 %v2086_v35, 0.0 }
 0x2e7   : > { %v2014_v58 = vpop.f32.mrf.mxu1 }
 0x2e8   : > { %v2117_v31 = vpack.c.bf16 %v2102_v6, %v2101_v27  ;;  %v2015_v25 = vadd.f32 %v2014_v58, %v1960_v29  ;;  %v1971_v33 = vpop.f32.mrf.mxu0 }
 0x2e9   : > { %v1972_v14 = vadd.f32 %v1971_v33, %v1916_v7 }
 0x2ea   : > { %2197 = vmatmul.bf16.vlgmr.msra.gmra.mxu2 %v2117_v31  ;;  %v2067_v41 = vadd.f32 %v4230_v42, %v2015_v25  ;;  %v1967_v42 = vadd.f32 %v1966_v40, %v1911_v3  ;;  %v1919_v22 = vpop.f32.mrf.mxu3 }
 0x2ec   : > { %v2087_v61 = vadd.f32 %v4297_v56, %v2067_v41 }
 0x2ee   : > { %v2103_v57 = vmax.f32 %v2087_v61, 0.0 }
 0x2ef   : > { %v2016_v49 = vpop.f32.mrf.mxu1 }
 0x2f0   : > { %v2017_v63 = vadd.f32 %v2016_v49, %v1962_v10  ;;  %v1974_v50 = vpop.f32.mrf.mxu0 }
 0x2f1   : > { %v1975_v36 = vadd.f32 %v1974_v50, %v1919_v22 }
 0x2f2   : > { %v2068_v38 = vadd.f32 %v4235_v45, %v2017_v63  ;;  %v1921_v21 = vpop.f32.mrf.mxu3 }
 0x2f4   : > { %v2088_v51 = vadd.f32 %v4297_v56, %v2068_v38 }
 0x2f6   : > { %v2104_v46 = vmax.f32 %v2088_v51, 0.0 }
 0x2f7   : > { %v2019_v53 = vpop.f32.mrf.mxu1 }
 0x2f8   : > { %v2118_v8 = vpack.c.bf16 %v2104_v46, %v2103_v57  ;;  %v2020_v17 = vadd.f32 %v2019_v53, %v1965_v15  ;;  %v1976_v60 = vpop.f32.mrf.mxu0 }
 0x2fa   : > { %2202 = vmatmul.bf16.gmra.mxu2 %v2118_v8  ;;  %v2069_v1 = vadd.f32 %v4240_v11, %v2020_v17  ;;  %v1924_v6 = vpop.f32.mrf.mxu3 }
 0x2fc   : > { %v2089_v52 = vadd.f32 %v4297_v56, %v2069_v1 }
 0x2fe   : > { %v2105_v23 = vmax.f32 %v2089_v52, 0.0 }
 0x2ff   : > { %v2021_v28 = vpop.f32.mrf.mxu1 }
 0x300   : > { %v2022_v48 = vadd.f32 %v2021_v28, %v1967_v42  ;;  %v1979_v58 = vpop.f32.mrf.mxu0 }
 0x301   : > { %v1980_v38 = vadd.f32 %v1979_v58, %v1924_v6 }
 0x302   : > { %v2070_v45 = vadd.f32 %v4245_v20, %v2022_v48  ;;  %v1926_v10 = vpop.f32.mrf.mxu3 }
 0x304   : > { %v2090_v24 = vadd.f32 %v4297_v56, %v2070_v45 }
 0x306   : > { %v2106_v9 = vmax.f32 %v2090_v24, 0.0 }
 0x307   : > { %v2024_v4 = vpop.f32.mrf.mxu1 }
 0x308   : > { %v2119_v47 = vpack.c.bf16 %v2106_v9, %v2105_v23  ;;  %v2025_v12 = vadd.f32 %v2024_v4, %v1970_v59  ;;  %v1981_v49 = vpop.f32.mrf.mxu0 }
 0x309   : > { %v1982_v46 = vadd.f32 %v1981_v49, %v1926_v10  ;;  %v4500_v10 = vld [vmem:[#allocation39_spill] sm:$0xff] }
 0x30a   : > { %2207 = vmatmul.bf16.gmra.mxu2 %v2119_v47  ;;  %v2071_v11 = vadd.f32 %v4250_v13, %v2025_v12  ;;  %v1977_v13 = vadd.f32 %v1976_v60, %v1921_v21  ;;  %v1929_v57 = vpop.f32.mrf.mxu3 }
 0x30c   : > { %v2091_v20 = vadd.f32 %v4297_v56, %v2071_v11 }
 0x30e   : > { %v2107_v62 = vmax.f32 %v2091_v20, 0.0 }
 0x30f   : > { %v2026_v0 = vpop.f32.mrf.mxu1 }
 0x310   : > { %v2027_v18 = vadd.f32 %v2026_v0, %v1972_v14  ;;  %v1984_v53 = vpop.f32.mrf.mxu0 }
 0x311   : > { %v1985_v48 = vadd.f32 %v1984_v53, %v1929_v57 }
 0x312   : > { %v2072_v37 = vadd.f32 %v4255_v32, %v2027_v18  ;;  %v1931_v1 = vpop.f32.mrf.mxu3 }
 0x314   : > { %v2092_v34 = vadd.f32 %v4297_v56, %v2072_v37 }
 0x316   : > { %v2108_v39 = vmax.f32 %v2092_v34, 0.0 }
 0x317   : > { %v2029_v35 = vpop.f32.mrf.mxu1 }
 0x318   : > { %v2120_v27 = vpack.c.bf16 %v2108_v39, %v2107_v62  ;;  %v2030_v3 = vadd.f32 %v2029_v35, %v1975_v36  ;;  %v1986_v45 = vpop.f32.mrf.mxu0 }
 0x319   : > { %v1987_v22 = vadd.f32 %v1986_v45, %v1931_v1  ;;  %v4504_v1 = vld [vmem:[#allocation43_spill] sm:$0xff] }
 0x31a   : > { %2212 = vmatmul.bf16.gmra.mxu2 %v2120_v27  ;;  %v2073_v29 = vadd.f32 %v4260_v44, %v2030_v3  ;;  %v1934_v50 = vpop.f32.mrf.mxu3  ;;  %v4333_v3 = vld [vmem:[%s4434_s6] ss:$0 sm:$0xff] }
 0x31c   : > { %v2093_v25 = vadd.f32 %v4297_v56, %v2073_v29 }
 0x31e   : > { %v2109_v63 = vmax.f32 %v2093_v25, 0.0 }
 0x31f   : > { %v2031_v31 = vpop.f32.mrf.mxu1 }
 0x320   : > { %v2032_v40 = vadd.f32 %v2031_v31, %v1977_v13  ;;  %v1989_v59 = vpop.f32.mrf.mxu0 }
 0x321   : > { %v1990_v21 = vadd.f32 %v1989_v59, %v1934_v50  ;;  %v4506_v50 = vld [vmem:[#allocation45_spill] sm:$0xff] }
 0x322   : > { %v2074_v32 = vadd.f32 %v4264_v26, %v2032_v40  ;;  %v1936_v60 = vpop.f32.mrf.mxu3 }
 0x324   : > { %v2094_v41 = vadd.f32 %v4297_v56, %v2074_v32 }
 0x326   : > { %v2110_v43 = vmax.f32 %v2094_v41, 0.0  ;;  %v2260_v41 = vunpack.c.l.bf16 %v4500_v10 }
 0x327   : > { %v2034_v61 = vpop.f32.mrf.mxu1 }
 0x328   : > { %v2121_v54 = vpack.c.bf16 %v2110_v43, %v2109_v63  ;;  %v2035_v51 = vadd.f32 %v2034_v61, %v1980_v38  ;;  %v1991_v20 = vpop.f32.mrf.mxu0  ;;  %v4501_v61 = vld [vmem:[#allocation40_spill] sm:$0xff] }
 0x329   : > { %v2261_v38 = vunpack.c.l.bf16 %v4501_v61 }
 0x32a   : > { %2217 = vmatmul.bf16.gmra.mxu2 %v2121_v54  ;;  %v2075_v44 = vadd.f32 %v4269_v16, %v2035_v51 }
 0x32c   : > { %v2095_v26 = vadd.f32 %v4297_v56, %v2075_v44 }
 0x32e   : > { %v2111_v33 = vmax.f32 %v2095_v26, 0.0  ;;  %v4503_v26 = vld [vmem:[#allocation42_spill] sm:$0xff] }
 0x32f   : > { %v2036_v15 = vpop.f32.mrf.mxu1 }
 0x330   : > { %v2037_v8 = vadd.f32 %v2036_v15, %v1982_v46  ;;  %v4502_v46 = vld [vmem:[#allocation41_spill] sm:$0xff] }
 0x331   : > { %v2262_v44 = vunpack.c.l.bf16 %v4502_v46 }
 0x332   : > { %v2076_v17 = vadd.f32 %v4273_v55, %v2037_v8 }
 0x334   : > { %v2096_v7 = vadd.f32 %v4297_v56, %v2076_v17  ;;  %v2263_v17 = vunpack.c.l.bf16 %v4503_v26 }
 0x336   : > { %v2112_v42 = vmax.f32 %v2096_v7, 0.0 }
 0x337   : > { %v2039_v28 = vpop.f32.mrf.mxu1 }
 0x338   : > { %v2122_v52 = vpack.c.bf16 %v2112_v42, %v2111_v33  ;;  %v2040_v24 = vadd.f32 %v2039_v28, %v1985_v48  ;;  %v2264_v28 = vunpack.c.l.bf16 %v4504_v1 }
 0x33a   : > { %2222 = vmatmul.bf16.gmra.mxu2 %v2122_v52  ;;  %v2077_v16 = vadd.f32 %v4278_v5, %v2040_v24  ;;  %v1992_v5 = vadd.f32 %v1991_v20, %v1936_v60  ;;  %v4505_v24 = vld [vmem:[#allocation44_spill] sm:$0xff] }
 0x33c   : > { %v2097_v4 = vadd.f32 %v4297_v56, %v2077_v16 }
 0x33e   : > { %v2113_v12 = vmax.f32 %v2097_v4, 0.0  ;;  %v2266_v4 = vunpack.c.l.bf16 %v4506_v50 }
 0x33f   : > { %v2041_v23 = vpop.f32.mrf.mxu1 }
 0x340   : > { %v2042_v9 = vadd.f32 %v2041_v23, %v1987_v22  ;;  %v2265_v22 = vunpack.c.l.bf16 %v4505_v24 }
 0x342   : > { %v2078_v55 = vadd.f32 %v4282_v19, %v2042_v9 }
 0x344   : > { %v2098_v47 = vadd.f32 %v4297_v56, %v2078_v55 }
 0x346   : > { %v2114_v14 = vmax.f32 %v2098_v47, 0.0 }
 0x347   : > { %v2044_v11 = vpop.f32.mrf.mxu1 }
 0x348   : > { %v2123_v0 = vpack.c.bf16 %v2114_v14, %v2113_v12  ;;  %v2045_v18 = vadd.f32 %v2044_v11, %v1990_v21  ;;  %v4507_v12 = vld [vmem:[#allocation46_spill] sm:$0xff] }
 0x349   : > { %v2267_v14 = vunpack.c.l.bf16 %v4507_v12 }
 0x34a   : > { %2227 = vmatmul.bf16.gmra.mxu2 %v2123_v0  ;;  %v2079_v37 = vadd.f32 %v4287_v30, %v2045_v18  ;;  %v4498_v30 = vld [vmem:[#allocation35_spill] sm:$0xff] }
 0x34b   : > { %v2258_v58 = vunpack.c.l.bf16 %v4498_v30  ;;  %v4508_v18 = vld [vmem:[#allocation47_spill] sm:$0xff] }
 0x34c   : > { %v2099_v19 = vadd.f32 %v4297_v56, %v2079_v37  ;;  %v2268_v60 = vunpack.c.l.bf16 %v4508_v18 }
 0x34e   : > { %v2115_v36 = vmax.f32 %v2099_v19, 0.0 }
 0x34f   : > { %v2046_v34 = vpop.f32.mrf.mxu1 }
 0x350   : > { %v2047_v62 = vadd.f32 %v2046_v34, %v1992_v5  ;;  %v4509_v34 = vld [vmem:[#allocation48_spill] sm:$0xff] }
 0x352   : > { %v2080_v39 = vadd.f32 %v4291_v2, %v2047_v62  ;;  %v4499_v2 = vld [vmem:[#allocation36_spill] sm:$0xff]  ;;  %v2269_v62 = vunpack.c.l.bf16 %v4509_v34 }
 0x354   : > { %v2100_v35 = vadd.f32 %v4297_v56, %v2080_v39  ;;  %v2259_v56 = vunpack.c.l.bf16 %v4499_v2 }
 0x356   : > { %v2116_v27 = vmax.f32 %v2100_v35, 0.0 }
 0x358   : > { %v2124_v6 = vpack.c.bf16 %v2116_v27, %v2115_v36  ;;  %v4510_v36 = vld [vmem:[#allocation33_spill] sm:$0xff] }
 0x359   : > { %v2270_v27 = vunpack.c.l.bf16 %v4510_v36 }
 0x35a   : > { %2232 = vmatmul.bf16.vlgmr.msra.gmra.mxu3 %v2124_v6 }
 0x36d   : > { %v2198_v13 = vpop.f32.mrf.mxu2 }
 0x36e   : > { %v2242_v29 = vadd.f32 %v4333_v3, %v2198_v13  ;;  %v4511_v13 = vld [vmem:[#allocation34_spill] sm:$0xff] }
 0x370   : > { %v2274_v31 = vadd.f32 %v2258_v58, %v2242_v29  ;;  %v2271_v29 = vunpack.c.l.bf16 %v4511_v13 }
 0x372   : > { %2290 = vst [vmem:[%s3629_s14] sm:$0xff] %v2274_v31 }
 0x375   : > { %v2200_v40 = vpop.f32.mrf.mxu2 }
 0x376   : > { %v2243_v25 = vadd.f32 %v4333_v3, %v2200_v40  ;;  %v4512_v40 = vld [vmem:[#allocation37_spill] sm:$0xff] }
 0x378   : > { %v2275_v32 = vadd.f32 %v2259_v56, %v2243_v25  ;;  %v2272_v25 = vunpack.c.l.bf16 %v4512_v40 }
 0x37a   : > { %2291 = vst [vmem:[%s3629_s14 + $0x8] sm:$0xff] %v2275_v32 }
 0x37d   : > { %v2203_v49 = vpop.f32.mrf.mxu2 }
 0x37e   : > { %v2244_v63 = vadd.f32 %v4333_v3, %v2203_v49  ;;  %v4513_v49 = vld [vmem:[#allocation38_spill] sm:$0xff] }
 0x380   : > { %v2276_v43 = vadd.f32 %v2260_v41, %v2244_v63  ;;  %v2273_v63 = vunpack.c.l.bf16 %v4513_v49 }
 0x382   : > { %2292 = vst [vmem:[%s3629_s14 + $0x10] sm:$0xff] %v2276_v43 }
 0x385   : > { %v2205_v54 = vpop.f32.mrf.mxu2 }
 0x386   : > { %v2245_v51 = vadd.f32 %v4333_v3, %v2205_v54 }
 0x388   : > { %v2277_v57 = vadd.f32 %v2261_v38, %v2245_v51 }
 0x38a   : > { %2293 = vst [vmem:[%s3629_s14 + $0x18] sm:$0xff] %v2277_v57 }
 0x38d   : > { %v2208_v53 = vpop.f32.mrf.mxu2 }
 0x38e   : > { %v2246_v15 = vadd.f32 %v4333_v3, %v2208_v53 }
 0x390   : > { %v2278_v8 = vadd.f32 %v2262_v44, %v2246_v15 }
 0x392   : > { %2294 = vst [vmem:[%s3629_s14 + $0x20] sm:$0xff] %v2278_v8 }
 0x395   : > { %v2210_v7 = vpop.f32.mrf.mxu2 }
 0x396   : > { %v2247_v33 = vadd.f32 %v4333_v3, %v2210_v7 }
 0x398   : > { %v2279_v42 = vadd.f32 %v2263_v17, %v2247_v33 }
 0x39a   : > { %2295 = vst [vmem:[%s3629_s14 + $0x28] sm:$0xff] %v2279_v42 }
 0x39d   : > { %v2213_v48 = vpop.f32.mrf.mxu2 }
 0x39e   : > { %v2248_v52 = vadd.f32 %v4333_v3, %v2213_v48 }
 0x3a0   : > { %v2280_v45 = vadd.f32 %v2264_v28, %v2248_v52 }
 0x3a2   : > { %2296 = vst [vmem:[%s3629_s14 + $0x30] sm:$0xff] %v2280_v45 }
 0x3a5   : > { %v2215_v16 = vpop.f32.mrf.mxu2 }
 0x3a6   : > { %v2249_v23 = vadd.f32 %v4333_v3, %v2215_v16 }
 0x3a8   : > { %v2281_v9 = vadd.f32 %v2265_v22, %v2249_v23 }
 0x3aa   : > { %2297 = vst [vmem:[%s3629_s14 + $0x38] sm:$0xff] %v2281_v9 }
 0x3ad   : > { %v2218_v55 = vpop.f32.mrf.mxu2 }
 0x3ae   : > { %v2250_v59 = vadd.f32 %v4333_v3, %v2218_v55 }
 0x3b0   : > { %v2282_v47 = vadd.f32 %v2266_v4, %v2250_v59 }
 0x3b2   : > { %2298 = vst [vmem:[%s3629_s14 + $0x40] sm:$0xff] %v2282_v47 }
 0x3b5   : > { %v2220_v11 = vpop.f32.mrf.mxu2 }
 0x3b6   : > { %v2251_v21 = vadd.f32 %v4333_v3, %v2220_v11 }
 0x3b8   : > { %v2283_v0 = vadd.f32 %v2267_v14, %v2251_v21 }
 0x3ba   : > { %2299 = vst [vmem:[%s3629_s14 + $0x48] sm:$0xff] %v2283_v0 }
 0x3bd   : > { %v2223_v20 = vpop.f32.mrf.mxu2 }
 0x3be   : > { %v2252_v5 = vadd.f32 %v4333_v3, %v2223_v20 }
 0x3c0   : > { %v2284_v37 = vadd.f32 %v2268_v60, %v2252_v5 }
 0x3c2   : > { %2300 = vst [vmem:[%s3629_s14 + $0x50] sm:$0xff] %v2284_v37 }
 0x3c5   : > { %v2225_v19 = vpop.f32.mrf.mxu2 }
 0x3c6   : > { %v2253_v39 = vadd.f32 %v4333_v3, %v2225_v19 }
 0x3c8   : > { %v2285_v35 = vadd.f32 %v2269_v62, %v2253_v39 }
 0x3ca   : > { %2301 = vst [vmem:[%s3629_s14 + $0x58] sm:$0xff] %v2285_v35 }
 0x3cd   : > { %v2228_v6 = vpop.f32.mrf.mxu2 }
 0x3ce   : > { %v2254_v30 = vadd.f32 %v4333_v3, %v2228_v6 }
 0x3d0   : > { %v2286_v58 = vadd.f32 %v2270_v27, %v2254_v30 }
 0x3d2   : > { %2302 = vst [vmem:[%s3629_s14 + $0x60] sm:$0xff] %v2286_v58 }
 0x3d5   : > { %v2230_v31 = vpop.f32.mrf.mxu2 }
 0x3d6   : > { %v2255_v2 = vadd.f32 %v4333_v3, %v2230_v31 }
 0x3d8   : > { %v2287_v56 = vadd.f32 %v2271_v29, %v2255_v2 }
 0x3da   : > { %2303 = vst [vmem:[%s3629_s14 + $0x68] sm:$0xff] %v2287_v56 }
 0x3dd   : > { %v2233_v32 = vpop.f32.mrf.mxu3 }
 0x3de   : > { %v2256_v10 = vadd.f32 %v4333_v3, %v2233_v32 }
 0x3e0   : > { %v2288_v41 = vadd.f32 %v2272_v25, %v2256_v10 }
 0x3e2   : > { %2304 = vst [vmem:[%s3629_s14 + $0x70] sm:$0xff] %v2288_v41 }
 0x3e5   : > { %v2235_v43 = vpop.f32.mrf.mxu3 }
 0x3e6   : > { %v2257_v61 = vadd.f32 %v4333_v3, %v2235_v43 }
 0x3e8   : > { %v2289_v38 = vadd.f32 %v2273_v63, %v2257_v61 }
 0x3ea   : > { %2305 = vst [vmem:[%s3629_s14 + $0x78] sm:$0xff] %v2289_v38 }
 0x3eb   : > { %3336 = shalt.err (!%p3333_p11)
}
 0x3ec   : > { %s3435_s3 = smov 128   ;;  %s3436_s14 = smov 8  }
 0x3ed   : > { %3031 = dma.vmem_to_hbm [thread:$0]  (%p3529_p3), %s2323_s24, 2048, %s2325_s12, %s2307_s11, %s3435_s3, %s3435_s3, %s3436_s14  }
 0x3ee PF: > { %s4514_s13 = sld [smem:[#allocation25_spill]]  ;;  %p3057_p12 = scmp.ge.s32.totalorder %s3421_s8, 2 }
 0x3f0   : > { %p3044_p13 = pnand %p3057_p12, %p3538_p8 }
 0x3f2   : > { %p3045_p0 = pneg %p3044_p13 }
 0x3f4   : > { %s2339_s29 = sand.u32 1, %s4514_s13  }
 0x3f5   : > { %s2340_s21 = scalar_lea.sflag [#allocation6], %s2339_s29 }
 0x3f6   : > { %3388 = dma.done.wait (%p3045_p0), %s2340_s21, 2048  }
 0x3f7   : > { %3390 = vsyncadd (%p3045_p0), %s2340_s21, 4294965248  ;;  %s22_s8 = sadd.s32 1, %s3421_s8   ;;  %s4516_s28 = sld [smem:[#allocation26_spill]] }
 0x3f8   : > { %p19_p1 = scmp.ge.s32.totalorder %s22_s8, 6   ;;  %s4517_s26 = sld [smem:[#allocation32_spill]] }
 0x3f9   : > { %s4518_s27 = sld [smem:[#allocation27_spill]]  ;;  %s4522_s24 = smov %s3397_s25 }
 0x3fa   : > { %s4519_s15 = sld [smem:[#allocation28_spill]] }
 0x3fb   : > { %s4520_s29 = sld [smem:[#allocation29_spill]] }
 0x3fc   : > { %s4521_s30 = sld [smem:[#allocation30_spill]]  ;;  %21 = sbr.rel (!%p19_p1) target bundleno = 9 (0x9), region = 137 }
 0x3fd   : > { %s4523_s25 = smov %s4516_s28 }
 0x400   : > { %s4524_s28 = smov %s4519_s15 }
 0x401   :  { %2346 = vsyncpa [#allocation5], 1 }
 0x402   :  { %2348 = vsyncpa [#allocation5 + $0x1], 1 }
 0x403   :  { %2349 = vsyncpa [#allocation8], 1 }
 0x404   :  { %2350 = vsyncpa [#allocation6], 1 }
 0x405   :  { %2352 = vsyncpa [#allocation6 + $0x1], 1 }
 0x406   :  { %2353 = vsyncmov [#allocation3] }
 0x409   :  { %s2354_s19 = vpop.sfrf %2353 }
 0x40a   :  { %p2844_p3 = scmp.ne.s32.totalorder %s2354_s19, 0 }
 0x40c   :  { %2358 = shalt.err (%p2844_p3)  }
 0x40d   :  { %2360 = vsyncmov [#allocation3 + $0x1] }
 0x410   :  { %s2361_s18 = vpop.sfrf %2360 }
 0x411   :  { %p2845_p8 = scmp.ne.s32.totalorder %s2361_s18, 0 }
 0x413   :  { %2365 = shalt.err (%p2845_p8)  }
 0x414   :  { %2367 = vsyncmov [#allocation3 + $0x2] }
 0x417   :  { %s2368_s16 = vpop.sfrf %2367 }
 0x418   :  { %p2846_p4 = scmp.ne.s32.totalorder %s2368_s16, 0 }
 0x41a   :  { %2372 = shalt.err (%p2846_p4)  }

</bundles_post_ra>
